<compile_context>
chip_gen: v6e
topology: v6e:2x2x1
jax: 0.10.0
libtpu: 0.0.40
codegen_flags: <defaults>
</compile_context>

<pallas_src>
import functools

import jax
import jax.numpy as jnp
from jax import lax
from jax.experimental import pallas as pl
from jax.experimental.pallas import tpu as pltpu


# ----------------------------------------------------------------------------
# Fused conv3x3(stride 2) + BatchNorm2d(batch stats) + ReLU kernel
# ----------------------------------------------------------------------------
def _downblock_kernel(x_ref, w_ref, gb_ref, o_ref, pat_s, acc_s, stat_s, *,
                      cin, ho, wo, n_total, eps):
    """Grid = (phase, batch).

    x_ref  : (1, 2, Hh, 2, Cin, Wh) parity-split padded input for this batch:
             x_ref[0, hp, hh, wp, ci, wh] = x_pad[b, ci, 2*hh+hp, 2*wh+wp]
    w_ref  : (Cout, K=9*Cin)  conv weight, K ordered (dy, dx, ci)
    gb_ref : (Cout, 2)        [:, 0] = gamma, [:, 1] = beta
    o_ref  : (1, Cout, Ho*Wo) per-batch output slab
    pat_s  : (K, Ho*Wo)       VMEM scratch: im2col patches of the current batch
    acc_s  : (B, Cout, Ho*Wo) VMEM scratch: conv outputs, resident across phases
    stat_s : (Cout, 2)        VMEM scratch: [sum, sum-of-squares] accumulators
    """
    phase = pl.program_id(0)
    b = pl.program_id(1)

    @pl.when(phase == 0)
    def _conv_and_stats():
        @pl.when(b == 0)
        def _init():
            stat_s[...] = jnp.zeros_like(stat_s)

        # In-kernel im2col: assemble the 9 stride-2 taps with static slices only.
        # Every load is a (Cin, Wo) row with integer indices on leading dims and
        # slices on the trailing (sublane, lane) dims -> no relayout, no HBM expansion.
        for dy in range(3):
            for dx in range(3):
                k0 = (dy * 3 + dx) * cin
                hp, wp = dy % 2, dx % 2
                hh0, wh0 = dy // 2, dx // 2
                for r in range(ho):
                    row = x_ref[0, hp, hh0 + r, wp, :, wh0:wh0 + wo]      # (Cin, Wo)
                    pat_s[k0:k0 + cin, r * wo:(r + 1) * wo] = row.astype(pat_s.dtype)

        # Single K=9*Cin matmul on the MXU with f32 accumulation.
        # Conv bias is intentionally omitted: it cancels under batch-stat BatchNorm.
        acc = jnp.dot(w_ref[...], pat_s[...],
                      preferred_element_type=jnp.float32)                # (Cout, HW)
        acc_s[b] = acc

        # Per-channel partial sums for BN statistics (cross-lane XLU reduce).
        stat_s[:, 0:1] += jnp.sum(acc, axis=1, keepdims=True)
        stat_s[:, 1:2] += jnp.sum(acc * acc, axis=1, keepdims=True)

    @pl.when(phase == 1)
    def _normalize():
        inv_n = 1.0 / float(n_total)
        mean = stat_s[:, 0:1] * inv_n                                    # (Cout, 1)
        var = jnp.maximum(stat_s[:, 1:2] * inv_n - mean * mean, 0.0)     # biased variance
        scale = lax.rsqrt(var + eps) * gb_ref[:, 0:1]                    # rsqrt on the EUP
        shift = gb_ref[:, 1:2] - mean * scale                            # single-FMA epilogue
        acc = acc_s[b]                                                   # (Cout, HW)
        o_ref[0] = jnp.maximum(acc * scale + shift, 0.0).astype(o_ref.dtype)


@functools.partial(jax.jit, static_argnames=("eps", "matmul_dtype"))
def down_block2d(x_nchw, w_oihw, bias, gamma, beta, eps=1e-5,
                 matmul_dtype=jnp.float32):
    """DownBlock2d forward.

    x: (B, Cin, H, W) f32, w: (Cout, Cin, 3, 3) OIHW, bias/gamma/beta: (Cout,).
    Returns (B, Cout, H//2, W//2).  For production sizes pass matmul_dtype=jnp.bfloat16.
    """
    B, Cin, H, W = x_nchw.shape
    Cout = w_oihw.shape[0]
    if H % 2 or W % 2:
        raise ValueError("kernel assumes even spatial dims (stride-2 parity split)")
    Ho, Wo = H // 2, W // 2
    Hh, Wh = (H + 2) // 2, (W + 2) // 2          # half sizes of the padded input
    HW = Ho * Wo
    K = 9 * Cin

    # Conv bias is mathematically dead under training-mode BatchNorm; drop it entirely.
    # TODO(synk): add it back into running_mean if running-stat tracking is modeled.
    del bias

    # Tiny XLA prologue (no size expansion): pad and split into stride-2 parity planes,
    # laid out so in-kernel tap loads are (Cin, Wo) rows on (sublane, lane).
    xp = jnp.pad(x_nchw, ((0, 0), (0, 0), (1, 1), (1, 1)))               # (B, Cin, H+2, W+2)
    xq = xp.reshape(B, Cin, Hh, 2, Wh, 2)
    xq = jnp.transpose(xq, (0, 3, 2, 5, 1, 4))                           # (B, 2, Hh, 2, Cin, Wh)
    xq = xq.astype(matmul_dtype)

    # Conv weight as a (Cout, K) matrix, K ordered (dy, dx, ci) to match the kernel.
    wmat = jnp.transpose(w_oihw, (0, 2, 3, 1)).reshape(Cout, K).astype(matmul_dtype)
    gb = jnp.stack([gamma, beta], axis=1)                                # (Cout, 2)

    kernel = functools.partial(_downblock_kernel, cin=Cin, ho=Ho, wo=Wo,
                               n_total=B * HW, eps=eps)

    y = pl.pallas_call(
        kernel,
        out_shape=jax.ShapeDtypeStruct((B, Cout, HW), x_nchw.dtype),
        grid=(2, B),                                                     # (phase, batch)
        in_specs=[
            # Parity-split input, one batch per grid step.
            pl.BlockSpec((1, 2, Hh, 2, Cin, Wh),
                         lambda p, b: (b, 0, 0, 0, 0, 0)),
            pl.BlockSpec((Cout, K), lambda p, b: (0, 0)),    # weights: fetched once
            pl.BlockSpec((Cout, 2), lambda p, b: (0, 0)),    # gamma/beta: one tiny DMA
        ],
        # All phase-0 steps map onto block 0 so the (unwritten) output buffer is never
        # flushed to HBM; phase 1 writes each batch slab exactly once.
        out_specs=pl.BlockSpec((1, Cout, HW), lambda p, b: (b * p, 0, 0)),
        scratch_shapes=[
            pltpu.VMEM((K, HW), matmul_dtype),           # im2col patches (current batch)
            pltpu.VMEM((B, Cout, HW), jnp.float32),      # conv outputs across phases
            pltpu.VMEM((Cout, 2), jnp.float32),          # BN sum / sum-of-squares
        ],
        compiler_params=pltpu.CompilerParams(
            # Both axes carry a dependency through the stats scratch -> sequential.
            dimension_semantics=("arbitrary", "arbitrary"),
            # Tiny here; re-derive at production tile sizes per generation
            # (64 MiB physical VMEM on v7x vs 128 MiB on v5e/v6e) with headroom.
            vmem_limit_bytes=32 * 1024 * 1024,
        ),
    )(xq, wmat, gb)

    # (B, Cout, Ho*Wo) -> (B, Cout, Ho, Wo): contiguous reshape, no transpose, no copy.
    return y.reshape(B, Cout, Ho, Wo)


# ----------------------------------------------------------------------------
# Pure-JAX reference (correctness check only)
# ----------------------------------------------------------------------------
def _ref_down_block2d(x, w, bias, gamma, beta, eps=1e-5):
    y = lax.conv_general_dilated(
        x, w, window_strides=(2, 2), padding=((1, 1), (1, 1)),
        dimension_numbers=("NCHW", "OIHW", "NCHW"))
    y = y + bias.reshape(1, -1, 1, 1)
    mean = jnp.mean(y, axis=(0, 2, 3), keepdims=True)
    var = jnp.mean(jnp.square(y - mean), axis=(0, 2, 3), keepdims=True)
    y = (y - mean) * lax.rsqrt(var + eps)
    y = y * gamma.reshape(1, -1, 1, 1) + beta.reshape(1, -1, 1, 1)
    return jnp.maximum(y, 0.0)


if __name__ == "__main__":
    B, Cin, Cout, H, W = 2, 4, 8, 16, 16
    key = jax.random.PRNGKey(0)
    kx, kw, kb, kg, kbe = jax.random.split(key, 5)

    x = jax.random.normal(kx, (B, Cin, H, W), jnp.float32)
    w = jax.random.normal(kw, (Cout, Cin, 3, 3), jnp.float32) * 0.1
    bias = jax.random.normal(kb, (Cout,), jnp.float32) * 0.1
    gamma = 1.0 + 0.1 * jax.random.normal(kg, (Cout,), jnp.float32)
    beta = 0.1 * jax.random.normal(kbe, (Cout,), jnp.float32)

    out = jax.block_until_ready(down_block2d(x, w, bias, gamma, beta))
    ref = jax.block_until_ready(_ref_down_block2d(x, w, bias, gamma, beta))

    assert out.shape == (B, Cout, H // 2, W // 2), out.shape
    err = float(jnp.abs(out - ref).max())
    assert jnp.allclose(out, ref, atol=1e-3, rtol=1e-3), err
    print("KERNEL_OK")
</pallas_src>

<mosaic_0001>
module attributes {stable_mosaic.version = 11 : i64} {
  func.func @_downblock_kernel(%arg0: i32, %arg1: i32, %arg2: memref<1x2x9x2x4x9xf32, #tpu.memory_space<vmem>>, %arg3: memref<8x36xf32, #tpu.memory_space<vmem>>, %arg4: memref<8x2xf32, #tpu.memory_space<vmem>>, %arg5: memref<1x8x64xf32, #tpu.memory_space<vmem>>, %arg6: memref<36x64xf32, #tpu.memory_space<vmem>>, %arg7: memref<2x8x64xf32, #tpu.memory_space<vmem>>, %arg8: memref<8x2xf32, #tpu.memory_space<vmem>>) attributes {dimension_semantics = [#tpu.dimension_semantics<arbitrary>, #tpu.dimension_semantics<arbitrary>], iteration_bounds = array<i64: 2, 2>, scalar_prefetch = 0 : i64, scratch_operands = 3 : i64, tpu.core_type = #tpu.core_type<tc>, window_params = [{transform_indices = @transform_0, window_bounds = array<i64: 1, 2, 9, 2, 4, 9>}, {pipeline_mode = #tpu.pipeline_mode<synchronous>, transform_indices = @transform_1, window_bounds = array<i64: 8, 36>}, {pipeline_mode = #tpu.pipeline_mode<synchronous>, transform_indices = @transform_2, window_bounds = array<i64: 8, 2>}, {transform_indices = @transform_3, window_bounds = array<i64: 1, 8, 64>}]} {
    %c0_i32 = arith.constant 0 : i32
    %0 = arith.cmpi eq, %arg0, %c0_i32 : i32
    %1 = arith.extui %0 : i1 to i32
    %c0_i32_0 = arith.constant 0 : i32
    %2 = arith.cmpi ne, %1, %c0_i32_0 : i32
    scf.if %2 {
      %c0_i32_2 = arith.constant 0 : i32
      %6 = arith.cmpi eq, %arg1, %c0_i32_2 : i32
      %7 = arith.extui %6 : i1 to i32
      %c0_i32_3 = arith.constant 0 : i32
      %8 = arith.cmpi ne, %7, %c0_i32_3 : i32
      scf.if %8 {
        %cst_578 = arith.constant 0.000000e+00 : f32
        %243 = vector.broadcast %cst_578 : f32 to vector<8x2xf32>
        %c0_579 = arith.constant 0 : index
        %c0_580 = arith.constant 0 : index
        %244 = vector.load %arg8[%c0_579, %c0_580] : memref<8x2xf32, #tpu.memory_space<vmem>>, vector<8x2xf32>
        tpu.vector_store %arg8[%c0_579, %c0_580], %243 {strides = array<i32>} : memref<8x2xf32, #tpu.memory_space<vmem>>, vector<8x2xf32>,
      } else {
      }
      %c0 = arith.constant 0 : index
      %c0_4 = arith.constant 0 : index
      %c0_5 = arith.constant 0 : index
      %c0_6 = arith.constant 0 : index
      %c0_7 = arith.constant 0 : index
      %c0_8 = arith.constant 0 : index
      %9 = vector.load %arg2[%c0, %c0_4, %c0_5, %c0_6, %c0_7, %c0_8] : memref<1x2x9x2x4x9xf32, #tpu.memory_space<vmem>>, vector<1x1x1x1x4x8xf32>
      %10 = vector.shape_cast %9 : vector<1x1x1x1x4x8xf32> to vector<4x8xf32>
      %c0_9 = arith.constant 0 : index
      %c0_10 = arith.constant 0 : index
      %11 = vector.load %arg6[%c0_9, %c0_10] : memref<36x64xf32, #tpu.memory_space<vmem>>, vector<4x8xf32>
      tpu.vector_store %arg6[%c0_9, %c0_10], %10 {strides = array<i32>} : memref<36x64xf32, #tpu.memory_space<vmem>>, vector<4x8xf32>,
      %c0_11 = arith.constant 0 : index
      %c0_12 = arith.constant 0 : index
      %c1 = arith.constant 1 : index
      %c0_13 = arith.constant 0 : index
      %c0_14 = arith.constant 0 : index
      %c0_15 = arith.constant 0 : index
      %12 = vector.load %arg2[%c0_11, %c0_12, %c1, %c0_13, %c0_14, %c0_15] : memref<1x2x9x2x4x9xf32, #tpu.memory_space<vmem>>, vector<1x1x1x1x4x8xf32>
      %13 = vector.shape_cast %12 : vector<1x1x1x1x4x8xf32> to vector<4x8xf32>
      %c0_16 = arith.constant 0 : index
      %c8 = arith.constant 8 : index
      %14 = vector.load %arg6[%c0_16, %c8] : memref<36x64xf32, #tpu.memory_space<vmem>>, vector<4x8xf32>
      tpu.vector_store %arg6[%c0_16, %c8], %13 {strides = array<i32>} : memref<36x64xf32, #tpu.memory_space<vmem>>, vector<4x8xf32>,
      %c0_17 = arith.constant 0 : index
      %c0_18 = arith.constant 0 : index
      %c2 = arith.constant 2 : index
      %c0_19 = arith.constant 0 : index
      %c0_20 = arith.constant 0 : index
      %c0_21 = arith.constant 0 : index
      %15 = vector.load %arg2[%c0_17, %c0_18, %c2, %c0_19, %c0_20, %c0_21] : memref<1x2x9x2x4x9xf32, #tpu.memory_space<vmem>>, vector<1x1x1x1x4x8xf32>
      %16 = vector.shape_cast %15 : vector<1x1x1x1x4x8xf32> to vector<4x8xf32>
      %c0_22 = arith.constant 0 : index
      %c16 = arith.constant 16 : index
      %17 = vector.load %arg6[%c0_22, %c16] : memref<36x64xf32, #tpu.memory_space<vmem>>, vector<4x8xf32>
      tpu.vector_store %arg6[%c0_22, %c16], %16 {strides = array<i32>} : memref<36x64xf32, #tpu.memory_space<vmem>>, vector<4x8xf32>,
      %c0_23 = arith.constant 0 : index
      %c0_24 = arith.constant 0 : index
      %c3 = arith.constant 3 : index
      %c0_25 = arith.constant 0 : index
      %c0_26 = arith.constant 0 : index
      %c0_27 = arith.constant 0 : index
      %18 = vector.load %arg2[%c0_23, %c0_24, %c3, %c0_25, %c0_26, %c0_27] : memref<1x2x9x2x4x9xf32, #tpu.memory_space<vmem>>, vector<1x1x1x1x4x8xf32>
      %19 = vector.shape_cast %18 : vector<1x1x1x1x4x8xf32> to vector<4x8xf32>
      %c0_28 = arith.constant 0 : index
      %c24 = arith.constant 24 : index
      %20 = vector.load %arg6[%c0_28, %c24] : memref<36x64xf32, #tpu.memory_space<vmem>>, vector<4x8xf32>
      tpu.vector_store %arg6[%c0_28, %c24], %19 {strides = array<i32>} : memref<36x64xf32, #tpu.memory_space<vmem>>, vector<4x8xf32>,
      %c0_29 = arith.constant 0 : index
      %c0_30 = arith.constant 0 : index
      %c4 = arith.constant 4 : index
      %c0_31 = arith.constant 0 : index
      %c0_32 = arith.constant 0 : index
      %c0_33 = arith.constant 0 : index
      %21 = vector.load %arg2[%c0_29, %c0_30, %c4, %c0_31, %c0_32, %c0_33] : memref<1x2x9x2x4x9xf32, #tpu.memory_space<vmem>>, vector<1x1x1x1x4x8xf32>
      %22 = vector.shape_cast %21 : vector<1x1x1x1x4x8xf32> to vector<4x8xf32>
      %c0_34 = arith.constant 0 : index
      %c32 = arith.constant 32 : index
      %23 = vector.load %arg6[%c0_34, %c32] : memref<36x64xf32, #tpu.memory_space<vmem>>, vector<4x8xf32>
      tpu.vector_store %arg6[%c0_34, %c32], %22 {strides = array<i32>} : memref<36x64xf32, #tpu.memory_space<vmem>>, vector<4x8xf32>,
      %c0_35 = arith.constant 0 : index
      %c0_36 = arith.constant 0 : index
      %c5 = arith.constant 5 : index
      %c0_37 = arith.constant 0 : index
      %c0_38 = arith.constant 0 : index
      %c0_39 = arith.constant 0 : index
      %24 = vector.load %arg2[%c0_35, %c0_36, %c5, %c0_37, %c0_38, %c0_39] : memref<1x2x9x2x4x9xf32, #tpu.memory_space<vmem>>, vector<1x1x1x1x4x8xf32>
      %25 = vector.shape_cast %24 : vector<1x1x1x1x4x8xf32> to vector<4x8xf32>
      %c0_40 = arith.constant 0 : index
      %c40 = arith.constant 40 : index
      %26 = vector.load %arg6[%c0_40, %c40] : memref<36x64xf32, #tpu.memory_space<vmem>>, vector<4x8xf32>
      tpu.vector_store %arg6[%c0_40, %c40], %25 {strides = array<i32>} : memref<36x64xf32, #tpu.memory_space<vmem>>, vector<4x8xf32>,
      %c0_41 = arith.constant 0 : index
      %c0_42 = arith.constant 0 : index
      %c6 = arith.constant 6 : index
      %c0_43 = arith.constant 0 : index
      %c0_44 = arith.constant 0 : index
      %c0_45 = arith.constant 0 : index
      %27 = vector.load %arg2[%c0_41, %c0_42, %c6, %c0_43, %c0_44, %c0_45] : memref<1x2x9x2x4x9xf32, #tpu.memory_space<vmem>>, vector<1x1x1x1x4x8xf32>
      %28 = vector.shape_cast %27 : vector<1x1x1x1x4x8xf32> to vector<4x8xf32>
      %c0_46 = arith.constant 0 : index
      %c48 = arith.constant 48 : index
      %29 = vector.load %arg6[%c0_46, %c48] : memref<36x64xf32, #tpu.memory_space<vmem>>, vector<4x8xf32>
      tpu.vector_store %arg6[%c0_46, %c48], %28 {strides = array<i32>} : memref<36x64xf32, #tpu.memory_space<vmem>>, vector<4x8xf32>,
      %c0_47 = arith.constant 0 : index
      %c0_48 = arith.constant 0 : index
      %c7 = arith.constant 7 : index
      %c0_49 = arith.constant 0 : index
      %c0_50 = arith.constant 0 : index
      %c0_51 = arith.constant 0 : index
      %30 = vector.load %arg2[%c0_47, %c0_48, %c7, %c0_49, %c0_50, %c0_51] : memref<1x2x9x2x4x9xf32, #tpu.memory_space<vmem>>, vector<1x1x1x1x4x8xf32>
      %31 = vector.shape_cast %30 : vector<1x1x1x1x4x8xf32> to vector<4x8xf32>
      %c0_52 = arith.constant 0 : index
      %c56 = arith.constant 56 : index
      %32 = vector.load %arg6[%c0_52, %c56] : memref<36x64xf32, #tpu.memory_space<vmem>>, vector<4x8xf32>
      tpu.vector_store %arg6[%c0_52, %c56], %31 {strides = array<i32>} : memref<36x64xf32, #tpu.memory_space<vmem>>, vector<4x8xf32>,
      %c0_53 = arith.constant 0 : index
      %c0_54 = arith.constant 0 : index
      %c0_55 = arith.constant 0 : index
      %c1_56 = arith.constant 1 : index
      %c0_57 = arith.constant 0 : index
      %c0_58 = arith.constant 0 : index
      %33 = vector.load %arg2[%c0_53, %c0_54, %c0_55, %c1_56, %c0_57, %c0_58] : memref<1x2x9x2x4x9xf32, #tpu.memory_space<vmem>>, vector<1x1x1x1x4x8xf32>
      %34 = vector.shape_cast %33 : vector<1x1x1x1x4x8xf32> to vector<4x8xf32>
      %c4_59 = arith.constant 4 : index
      %c0_60 = arith.constant 0 : index
      %35 = vector.load %arg6[%c4_59, %c0_60] : memref<36x64xf32, #tpu.memory_space<vmem>>, vector<4x8xf32>
      tpu.vector_store %arg6[%c4_59, %c0_60], %34 {strides = array<i32>} : memref<36x64xf32, #tpu.memory_space<vmem>>, vector<4x8xf32>,
      %c0_61 = arith.constant 0 : index
      %c0_62 = arith.constant 0 : index
      %c1_63 = arith.constant 1 : index
      %c1_64 = arith.constant 1 : index
      %c0_65 = arith.constant 0 : index
      %c0_66 = arith.constant 0 : index
      %36 = vector.load %arg2[%c0_61, %c0_62, %c1_63, %c1_64, %c0_65, %c0_66] : memref<1x2x9x2x4x9xf32, #tpu.memory_space<vmem>>, vector<1x1x1x1x4x8xf32>
      %37 = vector.shape_cast %36 : vector<1x1x1x1x4x8xf32> to vector<4x8xf32>
      %c4_67 = arith.constant 4 : index
      %c8_68 = arith.constant 8 : index
      %38 = vector.load %arg6[%c4_67, %c8_68] : memref<36x64xf32, #tpu.memory_space<vmem>>, vector<4x8xf32>
      tpu.vector_store %arg6[%c4_67, %c8_68], %37 {strides = array<i32>} : memref<36x64xf32, #tpu.memory_space<vmem>>, vector<4x8xf32>,
      %c0_69 = arith.constant 0 : index
      %c0_70 = arith.constant 0 : index
      %c2_71 = arith.constant 2 : index
      %c1_72 = arith.constant 1 : index
      %c0_73 = arith.constant 0 : index
      %c0_74 = arith.constant 0 : index
      %39 = vector.load %arg2[%c0_69, %c0_70, %c2_71, %c1_72, %c0_73, %c0_74] : memref<1x2x9x2x4x9xf32, #tpu.memory_space<vmem>>, vector<1x1x1x1x4x8xf32>
      %40 = vector.shape_cast %39 : vector<1x1x1x1x4x8xf32> to vector<4x8xf32>
      %c4_75 = arith.constant 4 : index
      %c16_76 = arith.constant 16 : index
      %41 = vector.load %arg6[%c4_75, %c16_76] : memref<36x64xf32, #tpu.memory_space<vmem>>, vector<4x8xf32>
      tpu.vector_store %arg6[%c4_75, %c16_76], %40 {strides = array<i32>} : memref<36x64xf32, #tpu.memory_space<vmem>>, vector<4x8xf32>,
      %c0_77 = arith.constant 0 : index
      %c0_78 = arith.constant 0 : index
      %c3_79 = arith.constant 3 : index
      %c1_80 = arith.constant 1 : index
      %c0_81 = arith.constant 0 : index
      %c0_82 = arith.constant 0 : index
      %42 = vector.load %arg2[%c0_77, %c0_78, %c3_79, %c1_80, %c0_81, %c0_82] : memref<1x2x9x2x4x9xf32, #tpu.memory_space<vmem>>, vector<1x1x1x1x4x8xf32>
      %43 = vector.shape_cast %42 : vector<1x1x1x1x4x8xf32> to vector<4x8xf32>
      %c4_83 = arith.constant 4 : index
      %c24_84 = arith.constant 24 : index
      %44 = vector.load %arg6[%c4_83, %c24_84] : memref<36x64xf32, #tpu.memory_space<vmem>>, vector<4x8xf32>
      tpu.vector_store %arg6[%c4_83, %c24_84], %43 {strides = array<i32>} : memref<36x64xf32, #tpu.memory_space<vmem>>, vector<4x8xf32>,
      %c0_85 = arith.constant 0 : index
      %c0_86 = arith.constant 0 : index
      %c4_87 = arith.constant 4 : index
      %c1_88 = arith.constant 1 : index
      %c0_89 = arith.constant 0 : index
      %c0_90 = arith.constant 0 : index
      %45 = vector.load %arg2[%c0_85, %c0_86, %c4_87, %c1_88, %c0_89, %c0_90] : memref<1x2x9x2x4x9xf32, #tpu.memory_space<vmem>>, vector<1x1x1x1x4x8xf32>
      %46 = vector.shape_cast %45 : vector<1x1x1x1x4x8xf32> to vector<4x8xf32>
      %c4_91 = arith.constant 4 : index
      %c32_92 = arith.constant 32 : index
      %47 = vector.load %arg6[%c4_91, %c32_92] : memref<36x64xf32, #tpu.memory_space<vmem>>, vector<4x8xf32>
      tpu.vector_store %arg6[%c4_91, %c32_92], %46 {strides = array<i32>} : memref<36x64xf32, #tpu.memory_space<vmem>>, vector<4x8xf32>,
      %c0_93 = arith.constant 0 : index
      %c0_94 = arith.constant 0 : index
      %c5_95 = arith.constant 5 : index
      %c1_96 = arith.constant 1 : index
      %c0_97 = arith.constant 0 : index
      %c0_98 = arith.constant 0 : index
      %48 = vector.load %arg2[%c0_93, %c0_94, %c5_95, %c1_96, %c0_97, %c0_98] : memref<1x2x9x2x4x9xf32, #tpu.memory_space<vmem>>, vector<1x1x1x1x4x8xf32>
      %49 = vector.shape_cast %48 : vector<1x1x1x1x4x8xf32> to vector<4x8xf32>
      %c4_99 = arith.constant 4 : index
      %c40_100 = arith.constant 40 : index
      %50 = vector.load %arg6[%c4_99, %c40_100] : memref<36x64xf32, #tpu.memory_space<vmem>>, vector<4x8xf32>
      tpu.vector_store %arg6[%c4_99, %c40_100], %49 {strides = array<i32>} : memref<36x64xf32, #tpu.memory_space<vmem>>, vector<4x8xf32>,
      %c0_101 = arith.constant 0 : index
      %c0_102 = arith.constant 0 : index
      %c6_103 = arith.constant 6 : index
      %c1_104 = arith.constant 1 : index
      %c0_105 = arith.constant 0 : index
      %c0_106 = arith.constant 0 : index
      %51 = vector.load %arg2[%c0_101, %c0_102, %c6_103, %c1_104, %c0_105, %c0_106] : memref<1x2x9x2x4x9xf32, #tpu.memory_space<vmem>>, vector<1x1x1x1x4x8xf32>
      %52 = vector.shape_cast %51 : vector<1x1x1x1x4x8xf32> to vector<4x8xf32>
      %c4_107 = arith.constant 4 : index
      %c48_108 = arith.constant 48 : index
      %53 = vector.load %arg6[%c4_107, %c48_108] : memref<36x64xf32, #tpu.memory_space<vmem>>, vector<4x8xf32>
      tpu.vector_store %arg6[%c4_107, %c48_108], %52 {strides = array<i32>} : memref<36x64xf32, #tpu.memory_space<vmem>>, vector<4x8xf32>,
      %c0_109 = arith.constant 0 : index
      %c0_110 = arith.constant 0 : index
      %c7_111 = arith.constant 7 : index
      %c1_112 = arith.constant 1 : index
      %c0_113 = arith.constant 0 : index
      %c0_114 = arith.constant 0 : index
      %54 = vector.load %arg2[%c0_109, %c0_110, %c7_111, %c1_112, %c0_113, %c0_114] : memref<1x2x9x2x4x9xf32, #tpu.memory_space<vmem>>, vector<1x1x1x1x4x8xf32>
      %55 = vector.shape_cast %54 : vector<1x1x1x1x4x8xf32> to vector<4x8xf32>
      %c4_115 = arith.constant 4 : index
      %c56_116 = arith.constant 56 : index
      %56 = vector.load %arg6[%c4_115, %c56_116] : memref<36x64xf32, #tpu.memory_space<vmem>>, vector<4x8xf32>
      tpu.vector_store %arg6[%c4_115, %c56_116], %55 {strides = array<i32>} : memref<36x64xf32, #tpu.memory_space<vmem>>, vector<4x8xf32>,
      %c0_117 = arith.constant 0 : index
      %c0_118 = arith.constant 0 : index
      %c0_119 = arith.constant 0 : index
      %c0_120 = arith.constant 0 : index
      %c0_121 = arith.constant 0 : index
      %c1_122 = arith.constant 1 : index
      %57 = vector.load %arg2[%c0_117, %c0_118, %c0_119, %c0_120, %c0_121, %c1_122] : memref<1x2x9x2x4x9xf32, #tpu.memory_space<vmem>>, vector<1x1x1x1x4x8xf32>
      %58 = vector.shape_cast %57 : vector<1x1x1x1x4x8xf32> to vector<4x8xf32>
      %c8_123 = arith.constant 8 : index
      %c0_124 = arith.constant 0 : index
      %59 = vector.load %arg6[%c8_123, %c0_124] : memref<36x64xf32, #tpu.memory_space<vmem>>, vector<4x8xf32>
      tpu.vector_store %arg6[%c8_123, %c0_124], %58 {strides = array<i32>} : memref<36x64xf32, #tpu.memory_space<vmem>>, vector<4x8xf32>,
      %c0_125 = arith.constant 0 : index
      %c0_126 = arith.constant 0 : index
      %c1_127 = arith.constant 1 : index
      %c0_128 = arith.constant 0 : index
      %c0_129 = arith.constant 0 : index
      %c1_130 = arith.constant 1 : index
      %60 = vector.load %arg2[%c0_125, %c0_126, %c1_127, %c0_128, %c0_129, %c1_130] : memref<1x2x9x2x4x9xf32, #tpu.memory_space<vmem>>, vector<1x1x1x1x4x8xf32>
      %61 = vector.shape_cast %60 : vector<1x1x1x1x4x8xf32> to vector<4x8xf32>
      %c8_131 = arith.constant 8 : index
      %c8_132 = arith.constant 8 : index
      %62 = vector.load %arg6[%c8_131, %c8_132] : memref<36x64xf32, #tpu.memory_space<vmem>>, vector<4x8xf32>
      tpu.vector_store %arg6[%c8_131, %c8_132], %61 {strides = array<i32>} : memref<36x64xf32, #tpu.memory_space<vmem>>, vector<4x8xf32>,
      %c0_133 = arith.constant 0 : index
      %c0_134 = arith.constant 0 : index
      %c2_135 = arith.constant 2 : index
      %c0_136 = arith.constant 0 : index
      %c0_137 = arith.constant 0 : index
      %c1_138 = arith.constant 1 : index
      %63 = vector.load %arg2[%c0_133, %c0_134, %c2_135, %c0_136, %c0_137, %c1_138] : memref<1x2x9x2x4x9xf32, #tpu.memory_space<vmem>>, vector<1x1x1x1x4x8xf32>
      %64 = vector.shape_cast %63 : vector<1x1x1x1x4x8xf32> to vector<4x8xf32>
      %c8_139 = arith.constant 8 : index
      %c16_140 = arith.constant 16 : index
      %65 = vector.load %arg6[%c8_139, %c16_140] : memref<36x64xf32, #tpu.memory_space<vmem>>, vector<4x8xf32>
      tpu.vector_store %arg6[%c8_139, %c16_140], %64 {strides = array<i32>} : memref<36x64xf32, #tpu.memory_space<vmem>>, vector<4x8xf32>,
      %c0_141 = arith.constant 0 : index
      %c0_142 = arith.constant 0 : index
      %c3_143 = arith.constant 3 : index
      %c0_144 = arith.constant 0 : index
      %c0_145 = arith.constant 0 : index
      %c1_146 = arith.constant 1 : index
      %66 = vector.load %arg2[%c0_141, %c0_142, %c3_143, %c0_144, %c0_145, %c1_146] : memref<1x2x9x2x4x9xf32, #tpu.memory_space<vmem>>, vector<1x1x1x1x4x8xf32>
      %67 = vector.shape_cast %66 : vector<1x1x1x1x4x8xf32> to vector<4x8xf32>
      %c8_147 = arith.constant 8 : index
      %c24_148 = arith.constant 24 : index
      %68 = vector.load %arg6[%c8_147, %c24_148] : memref<36x64xf32, #tpu.memory_space<vmem>>, vector<4x8xf32>
      tpu.vector_store %arg6[%c8_147, %c24_148], %67 {strides = array<i32>} : memref<36x64xf32, #tpu.memory_space<vmem>>, vector<4x8xf32>,
      %c0_149 = arith.constant 0 : index
      %c0_150 = arith.constant 0 : index
      %c4_151 = arith.constant 4 : index
      %c0_152 = arith.constant 0 : index
      %c0_153 = arith.constant 0 : index
      %c1_154 = arith.constant 1 : index
      %69 = vector.load %arg2[%c0_149, %c0_150, %c4_151, %c0_152, %c0_153, %c1_154] : memref<1x2x9x2x4x9xf32, #tpu.memory_space<vmem>>, vector<1x1x1x1x4x8xf32>
      %70 = vector.shape_cast %69 : vector<1x1x1x1x4x8xf32> to vector<4x8xf32>
      %c8_155 = arith.constant 8 : index
      %c32_156 = arith.constant 32 : index
      %71 = vector.load %arg6[%c8_155, %c32_156] : memref<36x64xf32, #tpu.memory_space<vmem>>, vector<4x8xf32>
      tpu.vector_store %arg6[%c8_155, %c32_156], %70 {strides = array<i32>} : memref<36x64xf32, #tpu.memory_space<vmem>>, vector<4x8xf32>,
      %c0_157 = arith.constant 0 : index
      %c0_158 = arith.constant 0 : index
      %c5_159 = arith.constant 5 : index
      %c0_160 = arith.constant 0 : index
      %c0_161 = arith.constant 0 : index
      %c1_162 = arith.constant 1 : index
      %72 = vector.load %arg2[%c0_157, %c0_158, %c5_159, %c0_160, %c0_161, %c1_162] : memref<1x2x9x2x4x9xf32, #tpu.memory_space<vmem>>, vector<1x1x1x1x4x8xf32>
      %73 = vector.shape_cast %72 : vector<1x1x1x1x4x8xf32> to vector<4x8xf32>
      %c8_163 = arith.constant 8 : index
      %c40_164 = arith.constant 40 : index
      %74 = vector.load %arg6[%c8_163, %c40_164] : memref<36x64xf32, #tpu.memory_space<vmem>>, vector<4x8xf32>
      tpu.vector_store %arg6[%c8_163, %c40_164], %73 {strides = array<i32>} : memref<36x64xf32, #tpu.memory_space<vmem>>, vector<4x8xf32>,
      %c0_165 = arith.constant 0 : index
      %c0_166 = arith.constant 0 : index
      %c6_167 = arith.constant 6 : index
      %c0_168 = arith.constant 0 : index
      %c0_169 = arith.constant 0 : index
      %c1_170 = arith.constant 1 : index
      %75 = vector.load %arg2[%c0_165, %c0_166, %c6_167, %c0_168, %c0_169, %c1_170] : memref<1x2x9x2x4x9xf32, #tpu.memory_space<vmem>>, vector<1x1x1x1x4x8xf32>
      %76 = vector.shape_cast %75 : vector<1x1x1x1x4x8xf32> to vector<4x8xf32>
      %c8_171 = arith.constant 8 : index
      %c48_172 = arith.constant 48 : index
      %77 = vector.load %arg6[%c8_171, %c48_172] : memref<36x64xf32, #tpu.memory_space<vmem>>, vector<4x8xf32>
      tpu.vector_store %arg6[%c8_171, %c48_172], %76 {strides = array<i32>} : memref<36x64xf32, #tpu.memory_space<vmem>>, vector<4x8xf32>,
      %c0_173 = arith.constant 0 : index
      %c0_174 = arith.constant 0 : index
      %c7_175 = arith.constant 7 : index
      %c0_176 = arith.constant 0 : index
      %c0_177 = arith.constant 0 : index
      %c1_178 = arith.constant 1 : index
      %78 = vector.load %arg2[%c0_173, %c0_174, %c7_175, %c0_176, %c0_177, %c1_178] : memref<1x2x9x2x4x9xf32, #tpu.memory_space<vmem>>, vector<1x1x1x1x4x8xf32>
      %79 = vector.shape_cast %78 : vector<1x1x1x1x4x8xf32> to vector<4x8xf32>
      %c8_179 = arith.constant 8 : index
      %c56_180 = arith.constant 56 : index
      %80 = vector.load %arg6[%c8_179, %c56_180] : memref<36x64xf32, #tpu.memory_space<vmem>>, vector<4x8xf32>
      tpu.vector_store %arg6[%c8_179, %c56_180], %79 {strides = array<i32>} : memref<36x64xf32, #tpu.memory_space<vmem>>, vector<4x8xf32>,
      %c0_181 = arith.constant 0 : index
      %c1_182 = arith.constant 1 : index
      %c0_183 = arith.constant 0 : index
      %c0_184 = arith.constant 0 : index
      %c0_185 = arith.constant 0 : index
      %c0_186 = arith.constant 0 : index
      %81 = vector.load %arg2[%c0_181, %c1_182, %c0_183, %c0_184, %c0_185, %c0_186] : memref<1x2x9x2x4x9xf32, #tpu.memory_space<vmem>>, vector<1x1x1x1x4x8xf32>
      %82 = vector.shape_cast %81 : vector<1x1x1x1x4x8xf32> to vector<4x8xf32>
      %c12 = arith.constant 12 : index
      %c0_187 = arith.constant 0 : index
      %83 = vector.load %arg6[%c12, %c0_187] : memref<36x64xf32, #tpu.memory_space<vmem>>, vector<4x8xf32>
      tpu.vector_store %arg6[%c12, %c0_187], %82 {strides = array<i32>} : memref<36x64xf32, #tpu.memory_space<vmem>>, vector<4x8xf32>,
      %c0_188 = arith.constant 0 : index
      %c1_189 = arith.constant 1 : index
      %c1_190 = arith.constant 1 : index
      %c0_191 = arith.constant 0 : index
      %c0_192 = arith.constant 0 : index
      %c0_193 = arith.constant 0 : index
      %84 = vector.load %arg2[%c0_188, %c1_189, %c1_190, %c0_191, %c0_192, %c0_193] : memref<1x2x9x2x4x9xf32, #tpu.memory_space<vmem>>, vector<1x1x1x1x4x8xf32>
      %85 = vector.shape_cast %84 : vector<1x1x1x1x4x8xf32> to vector<4x8xf32>
      %c12_194 = arith.constant 12 : index
      %c8_195 = arith.constant 8 : index
      %86 = vector.load %arg6[%c12_194, %c8_195] : memref<36x64xf32, #tpu.memory_space<vmem>>, vector<4x8xf32>
      tpu.vector_store %arg6[%c12_194, %c8_195], %85 {strides = array<i32>} : memref<36x64xf32, #tpu.memory_space<vmem>>, vector<4x8xf32>,
      %c0_196 = arith.constant 0 : index
      %c1_197 = arith.constant 1 : index
      %c2_198 = arith.constant 2 : index
      %c0_199 = arith.constant 0 : index
      %c0_200 = arith.constant 0 : index
      %c0_201 = arith.constant 0 : index
      %87 = vector.load %arg2[%c0_196, %c1_197, %c2_198, %c0_199, %c0_200, %c0_201] : memref<1x2x9x2x4x9xf32, #tpu.memory_space<vmem>>, vector<1x1x1x1x4x8xf32>
      %88 = vector.shape_cast %87 : vector<1x1x1x1x4x8xf32> to vector<4x8xf32>
      %c12_202 = arith.constant 12 : index
      %c16_203 = arith.constant 16 : index
      %89 = vector.load %arg6[%c12_202, %c16_203] : memref<36x64xf32, #tpu.memory_space<vmem>>, vector<4x8xf32>
      tpu.vector_store %arg6[%c12_202, %c16_203], %88 {strides = array<i32>} : memref<36x64xf32, #tpu.memory_space<vmem>>, vector<4x8xf32>,
      %c0_204 = arith.constant 0 : index
      %c1_205 = arith.constant 1 : index
      %c3_206 = arith.constant 3 : index
      %c0_207 = arith.constant 0 : index
      %c0_208 = arith.constant 0 : index
      %c0_209 = arith.constant 0 : index
      %90 = vector.load %arg2[%c0_204, %c1_205, %c3_206, %c0_207, %c0_208, %c0_209] : memref<1x2x9x2x4x9xf32, #tpu.memory_space<vmem>>, vector<1x1x1x1x4x8xf32>
      %91 = vector.shape_cast %90 : vector<1x1x1x1x4x8xf32> to vector<4x8xf32>
      %c12_210 = arith.constant 12 : index
      %c24_211 = arith.constant 24 : index
      %92 = vector.load %arg6[%c12_210, %c24_211] : memref<36x64xf32, #tpu.memory_space<vmem>>, vector<4x8xf32>
      tpu.vector_store %arg6[%c12_210, %c24_211], %91 {strides = array<i32>} : memref<36x64xf32, #tpu.memory_space<vmem>>, vector<4x8xf32>,
      %c0_212 = arith.constant 0 : index
      %c1_213 = arith.constant 1 : index
      %c4_214 = arith.constant 4 : index
      %c0_215 = arith.constant 0 : index
      %c0_216 = arith.constant 0 : index
      %c0_217 = arith.constant 0 : index
      %93 = vector.load %arg2[%c0_212, %c1_213, %c4_214, %c0_215, %c0_216, %c0_217] : memref<1x2x9x2x4x9xf32, #tpu.memory_space<vmem>>, vector<1x1x1x1x4x8xf32>
      %94 = vector.shape_cast %93 : vector<1x1x1x1x4x8xf32> to vector<4x8xf32>
      %c12_218 = arith.constant 12 : index
      %c32_219 = arith.constant 32 : index
      %95 = vector.load %arg6[%c12_218, %c32_219] : memref<36x64xf32, #tpu.memory_space<vmem>>, vector<4x8xf32>
      tpu.vector_store %arg6[%c12_218, %c32_219], %94 {strides = array<i32>} : memref<36x64xf32, #tpu.memory_space<vmem>>, vector<4x8xf32>,
      %c0_220 = arith.constant 0 : index
      %c1_221 = arith.constant 1 : index
      %c5_222 = arith.constant 5 : index
      %c0_223 = arith.constant 0 : index
      %c0_224 = arith.constant 0 : index
      %c0_225 = arith.constant 0 : index
      %96 = vector.load %arg2[%c0_220, %c1_221, %c5_222, %c0_223, %c0_224, %c0_225] : memref<1x2x9x2x4x9xf32, #tpu.memory_space<vmem>>, vector<1x1x1x1x4x8xf32>
      %97 = vector.shape_cast %96 : vector<1x1x1x1x4x8xf32> to vector<4x8xf32>
      %c12_226 = arith.constant 12 : index
      %c40_227 = arith.constant 40 : index
      %98 = vector.load %arg6[%c12_226, %c40_227] : memref<36x64xf32, #tpu.memory_space<vmem>>, vector<4x8xf32>
      tpu.vector_store %arg6[%c12_226, %c40_227], %97 {strides = array<i32>} : memref<36x64xf32, #tpu.memory_space<vmem>>, vector<4x8xf32>,
      %c0_228 = arith.constant 0 : index
      %c1_229 = arith.constant 1 : index
      %c6_230 = arith.constant 6 : index
      %c0_231 = arith.constant 0 : index
      %c0_232 = arith.constant 0 : index
      %c0_233 = arith.constant 0 : index
      %99 = vector.load %arg2[%c0_228, %c1_229, %c6_230, %c0_231, %c0_232, %c0_233] : memref<1x2x9x2x4x9xf32, #tpu.memory_space<vmem>>, vector<1x1x1x1x4x8xf32>
      %100 = vector.shape_cast %99 : vector<1x1x1x1x4x8xf32> to vector<4x8xf32>
      %c12_234 = arith.constant 12 : index
      %c48_235 = arith.constant 48 : index
      %101 = vector.load %arg6[%c12_234, %c48_235] : memref<36x64xf32, #tpu.memory_space<vmem>>, vector<4x8xf32>
      tpu.vector_store %arg6[%c12_234, %c48_235], %100 {strides = array<i32>} : memref<36x64xf32, #tpu.memory_space<vmem>>, vector<4x8xf32>,
      %c0_236 = arith.constant 0 : index
      %c1_237 = arith.constant 1 : index
      %c7_238 = arith.constant 7 : index
      %c0_239 = arith.constant 0 : index
      %c0_240 = arith.constant 0 : index
      %c0_241 = arith.constant 0 : index
      %102 = vector.load %arg2[%c0_236, %c1_237, %c7_238, %c0_239, %c0_240, %c0_241] : memref<1x2x9x2x4x9xf32, #tpu.memory_space<vmem>>, vector<1x1x1x1x4x8xf32>
      %103 = vector.shape_cast %102 : vector<1x1x1x1x4x8xf32> to vector<4x8xf32>
      %c12_242 = arith.constant 12 : index
      %c56_243 = arith.constant 56 : index
      %104 = vector.load %arg6[%c12_242, %c56_243] : memref<36x64xf32, #tpu.memory_space<vmem>>, vector<4x8xf32>
      tpu.vector_store %arg6[%c12_242, %c56_243], %103 {strides = array<i32>} : memref<36x64xf32, #tpu.memory_space<vmem>>, vector<4x8xf32>,
      %c0_244 = arith.constant 0 : index
      %c1_245 = arith.constant 1 : index
      %c0_246 = arith.constant 0 : index
      %c1_247 = arith.constant 1 : index
      %c0_248 = arith.constant 0 : index
      %c0_249 = arith.constant 0 : index
      %105 = vector.load %arg2[%c0_244, %c1_245, %c0_246, %c1_247, %c0_248, %c0_249] : memref<1x2x9x2x4x9xf32, #tpu.memory_space<vmem>>, vector<1x1x1x1x4x8xf32>
      %106 = vector.shape_cast %105 : vector<1x1x1x1x4x8xf32> to vector<4x8xf32>
      %c16_250 = arith.constant 16 : index
      %c0_251 = arith.constant 0 : index
      %107 = vector.load %arg6[%c16_250, %c0_251] : memref<36x64xf32, #tpu.memory_space<vmem>>, vector<4x8xf32>
      tpu.vector_store %arg6[%c16_250, %c0_251], %106 {strides = array<i32>} : memref<36x64xf32, #tpu.memory_space<vmem>>, vector<4x8xf32>,
      %c0_252 = arith.constant 0 : index
      %c1_253 = arith.constant 1 : index
      %c1_254 = arith.constant 1 : index
      %c1_255 = arith.constant 1 : index
      %c0_256 = arith.constant 0 : index
      %c0_257 = arith.constant 0 : index
      %108 = vector.load %arg2[%c0_252, %c1_253, %c1_254, %c1_255, %c0_256, %c0_257] : memref<1x2x9x2x4x9xf32, #tpu.memory_space<vmem>>, vector<1x1x1x1x4x8xf32>
      %109 = vector.shape_cast %108 : vector<1x1x1x1x4x8xf32> to vector<4x8xf32>
      %c16_258 = arith.constant 16 : index
      %c8_259 = arith.constant 8 : index
      %110 = vector.load %arg6[%c16_258, %c8_259] : memref<36x64xf32, #tpu.memory_space<vmem>>, vector<4x8xf32>
      tpu.vector_store %arg6[%c16_258, %c8_259], %109 {strides = array<i32>} : memref<36x64xf32, #tpu.memory_space<vmem>>, vector<4x8xf32>,
      %c0_260 = arith.constant 0 : index
      %c1_261 = arith.constant 1 : index
      %c2_262 = arith.constant 2 : index
      %c1_263 = arith.constant 1 : index
      %c0_264 = arith.constant 0 : index
      %c0_265 = arith.constant 0 : index
      %111 = vector.load %arg2[%c0_260, %c1_261, %c2_262, %c1_263, %c0_264, %c0_265] : memref<1x2x9x2x4x9xf32, #tpu.memory_space<vmem>>, vector<1x1x1x1x4x8xf32>
      %112 = vector.shape_cast %111 : vector<1x1x1x1x4x8xf32> to vector<4x8xf32>
      %c16_266 = arith.constant 16 : index
      %c16_267 = arith.constant 16 : index
      %113 = vector.load %arg6[%c16_266, %c16_267] : memref<36x64xf32, #tpu.memory_space<vmem>>, vector<4x8xf32>
      tpu.vector_store %arg6[%c16_266, %c16_267], %112 {strides = array<i32>} : memref<36x64xf32, #tpu.memory_space<vmem>>, vector<4x8xf32>,
      %c0_268 = arith.constant 0 : index
      %c1_269 = arith.constant 1 : index
      %c3_270 = arith.constant 3 : index
      %c1_271 = arith.constant 1 : index
      %c0_272 = arith.constant 0 : index
      %c0_273 = arith.constant 0 : index
      %114 = vector.load %arg2[%c0_268, %c1_269, %c3_270, %c1_271, %c0_272, %c0_273] : memref<1x2x9x2x4x9xf32, #tpu.memory_space<vmem>>, vector<1x1x1x1x4x8xf32>
      %115 = vector.shape_cast %114 : vector<1x1x1x1x4x8xf32> to vector<4x8xf32>
      %c16_274 = arith.constant 16 : index
      %c24_275 = arith.constant 24 : index
      %116 = vector.load %arg6[%c16_274, %c24_275] : memref<36x64xf32, #tpu.memory_space<vmem>>, vector<4x8xf32>
      tpu.vector_store %arg6[%c16_274, %c24_275], %115 {strides = array<i32>} : memref<36x64xf32, #tpu.memory_space<vmem>>, vector<4x8xf32>,
      %c0_276 = arith.constant 0 : index
      %c1_277 = arith.constant 1 : index
      %c4_278 = arith.constant 4 : index
      %c1_279 = arith.constant 1 : index
      %c0_280 = arith.constant 0 : index
      %c0_281 = arith.constant 0 : index
      %117 = vector.load %arg2[%c0_276, %c1_277, %c4_278, %c1_279, %c0_280, %c0_281] : memref<1x2x9x2x4x9xf32, #tpu.memory_space<vmem>>, vector<1x1x1x1x4x8xf32>
      %118 = vector.shape_cast %117 : vector<1x1x1x1x4x8xf32> to vector<4x8xf32>
      %c16_282 = arith.constant 16 : index
      %c32_283 = arith.constant 32 : index
      %119 = vector.load %arg6[%c16_282, %c32_283] : memref<36x64xf32, #tpu.memory_space<vmem>>, vector<4x8xf32>
      tpu.vector_store %arg6[%c16_282, %c32_283], %118 {strides = array<i32>} : memref<36x64xf32, #tpu.memory_space<vmem>>, vector<4x8xf32>,
      %c0_284 = arith.constant 0 : index
      %c1_285 = arith.constant 1 : index
      %c5_286 = arith.constant 5 : index
      %c1_287 = arith.constant 1 : index
      %c0_288 = arith.constant 0 : index
      %c0_289 = arith.constant 0 : index
      %120 = vector.load %arg2[%c0_284, %c1_285, %c5_286, %c1_287, %c0_288, %c0_289] : memref<1x2x9x2x4x9xf32, #tpu.memory_space<vmem>>, vector<1x1x1x1x4x8xf32>
      %121 = vector.shape_cast %120 : vector<1x1x1x1x4x8xf32> to vector<4x8xf32>
      %c16_290 = arith.constant 16 : index
      %c40_291 = arith.constant 40 : index
      %122 = vector.load %arg6[%c16_290, %c40_291] : memref<36x64xf32, #tpu.memory_space<vmem>>, vector<4x8xf32>
      tpu.vector_store %arg6[%c16_290, %c40_291], %121 {strides = array<i32>} : memref<36x64xf32, #tpu.memory_space<vmem>>, vector<4x8xf32>,
      %c0_292 = arith.constant 0 : index
      %c1_293 = arith.constant 1 : index
      %c6_294 = arith.constant 6 : index
      %c1_295 = arith.constant 1 : index
      %c0_296 = arith.constant 0 : index
      %c0_297 = arith.constant 0 : index
      %123 = vector.load %arg2[%c0_292, %c1_293, %c6_294, %c1_295, %c0_296, %c0_297] : memref<1x2x9x2x4x9xf32, #tpu.memory_space<vmem>>, vector<1x1x1x1x4x8xf32>
      %124 = vector.shape_cast %123 : vector<1x1x1x1x4x8xf32> to vector<4x8xf32>
      %c16_298 = arith.constant 16 : index
      %c48_299 = arith.constant 48 : index
      %125 = vector.load %arg6[%c16_298, %c48_299] : memref<36x64xf32, #tpu.memory_space<vmem>>, vector<4x8xf32>
      tpu.vector_store %arg6[%c16_298, %c48_299], %124 {strides = array<i32>} : memref<36x64xf32, #tpu.memory_space<vmem>>, vector<4x8xf32>,
      %c0_300 = arith.constant 0 : index
      %c1_301 = arith.constant 1 : index
      %c7_302 = arith.constant 7 : index
      %c1_303 = arith.constant 1 : index
      %c0_304 = arith.constant 0 : index
      %c0_305 = arith.constant 0 : index
      %126 = vector.load %arg2[%c0_300, %c1_301, %c7_302, %c1_303, %c0_304, %c0_305] : memref<1x2x9x2x4x9xf32, #tpu.memory_space<vmem>>, vector<1x1x1x1x4x8xf32>
      %127 = vector.shape_cast %126 : vector<1x1x1x1x4x8xf32> to vector<4x8xf32>
      %c16_306 = arith.constant 16 : index
      %c56_307 = arith.constant 56 : index
      %128 = vector.load %arg6[%c16_306, %c56_307] : memref<36x64xf32, #tpu.memory_space<vmem>>, vector<4x8xf32>
      tpu.vector_store %arg6[%c16_306, %c56_307], %127 {strides = array<i32>} : memref<36x64xf32, #tpu.memory_space<vmem>>, vector<4x8xf32>,
      %c0_308 = arith.constant 0 : index
      %c1_309 = arith.constant 1 : index
      %c0_310 = arith.constant 0 : index
      %c0_311 = arith.constant 0 : index
      %c0_312 = arith.constant 0 : index
      %c1_313 = arith.constant 1 : index
      %129 = vector.load %arg2[%c0_308, %c1_309, %c0_310, %c0_311, %c0_312, %c1_313] : memref<1x2x9x2x4x9xf32, #tpu.memory_space<vmem>>, vector<1x1x1x1x4x8xf32>
      %130 = vector.shape_cast %129 : vector<1x1x1x1x4x8xf32> to vector<4x8xf32>
      %c20 = arith.constant 20 : index
      %c0_314 = arith.constant 0 : index
      %131 = vector.load %arg6[%c20, %c0_314] : memref<36x64xf32, #tpu.memory_space<vmem>>, vector<4x8xf32>
      tpu.vector_store %arg6[%c20, %c0_314], %130 {strides = array<i32>} : memref<36x64xf32, #tpu.memory_space<vmem>>, vector<4x8xf32>,
      %c0_315 = arith.constant 0 : index
      %c1_316 = arith.constant 1 : index
      %c1_317 = arith.constant 1 : index
      %c0_318 = arith.constant 0 : index
      %c0_319 = arith.constant 0 : index
      %c1_320 = arith.constant 1 : index
      %132 = vector.load %arg2[%c0_315, %c1_316, %c1_317, %c0_318, %c0_319, %c1_320] : memref<1x2x9x2x4x9xf32, #tpu.memory_space<vmem>>, vector<1x1x1x1x4x8xf32>
      %133 = vector.shape_cast %132 : vector<1x1x1x1x4x8xf32> to vector<4x8xf32>
      %c20_321 = arith.constant 20 : index
      %c8_322 = arith.constant 8 : index
      %134 = vector.load %arg6[%c20_321, %c8_322] : memref<36x64xf32, #tpu.memory_space<vmem>>, vector<4x8xf32>
      tpu.vector_store %arg6[%c20_321, %c8_322], %133 {strides = array<i32>} : memref<36x64xf32, #tpu.memory_space<vmem>>, vector<4x8xf32>,
      %c0_323 = arith.constant 0 : index
      %c1_324 = arith.constant 1 : index
      %c2_325 = arith.constant 2 : index
      %c0_326 = arith.constant 0 : index
      %c0_327 = arith.constant 0 : index
      %c1_328 = arith.constant 1 : index
      %135 = vector.load %arg2[%c0_323, %c1_324, %c2_325, %c0_326, %c0_327, %c1_328] : memref<1x2x9x2x4x9xf32, #tpu.memory_space<vmem>>, vector<1x1x1x1x4x8xf32>
      %136 = vector.shape_cast %135 : vector<1x1x1x1x4x8xf32> to vector<4x8xf32>
      %c20_329 = arith.constant 20 : index
      %c16_330 = arith.constant 16 : index
      %137 = vector.load %arg6[%c20_329, %c16_330] : memref<36x64xf32, #tpu.memory_space<vmem>>, vector<4x8xf32>
      tpu.vector_store %arg6[%c20_329, %c16_330], %136 {strides = array<i32>} : memref<36x64xf32, #tpu.memory_space<vmem>>, vector<4x8xf32>,
      %c0_331 = arith.constant 0 : index
      %c1_332 = arith.constant 1 : index
      %c3_333 = arith.constant 3 : index
      %c0_334 = arith.constant 0 : index
      %c0_335 = arith.constant 0 : index
      %c1_336 = arith.constant 1 : index
      %138 = vector.load %arg2[%c0_331, %c1_332, %c3_333, %c0_334, %c0_335, %c1_336] : memref<1x2x9x2x4x9xf32, #tpu.memory_space<vmem>>, vector<1x1x1x1x4x8xf32>
      %139 = vector.shape_cast %138 : vector<1x1x1x1x4x8xf32> to vector<4x8xf32>
      %c20_337 = arith.constant 20 : index
      %c24_338 = arith.constant 24 : index
      %140 = vector.load %arg6[%c20_337, %c24_338] : memref<36x64xf32, #tpu.memory_space<vmem>>, vector<4x8xf32>
      tpu.vector_store %arg6[%c20_337, %c24_338], %139 {strides = array<i32>} : memref<36x64xf32, #tpu.memory_space<vmem>>, vector<4x8xf32>,
      %c0_339 = arith.constant 0 : index
      %c1_340 = arith.constant 1 : index
      %c4_341 = arith.constant 4 : index
      %c0_342 = arith.constant 0 : index
      %c0_343 = arith.constant 0 : index
      %c1_344 = arith.constant 1 : index
      %141 = vector.load %arg2[%c0_339, %c1_340, %c4_341, %c0_342, %c0_343, %c1_344] : memref<1x2x9x2x4x9xf32, #tpu.memory_space<vmem>>, vector<1x1x1x1x4x8xf32>
      %142 = vector.shape_cast %141 : vector<1x1x1x1x4x8xf32> to vector<4x8xf32>
      %c20_345 = arith.constant 20 : index
      %c32_346 = arith.constant 32 : index
      %143 = vector.load %arg6[%c20_345, %c32_346] : memref<36x64xf32, #tpu.memory_space<vmem>>, vector<4x8xf32>
      tpu.vector_store %arg6[%c20_345, %c32_346], %142 {strides = array<i32>} : memref<36x64xf32, #tpu.memory_space<vmem>>, vector<4x8xf32>,
      %c0_347 = arith.constant 0 : index
      %c1_348 = arith.constant 1 : index
      %c5_349 = arith.constant 5 : index
      %c0_350 = arith.constant 0 : index
      %c0_351 = arith.constant 0 : index
      %c1_352 = arith.constant 1 : index
      %144 = vector.load %arg2[%c0_347, %c1_348, %c5_349, %c0_350, %c0_351, %c1_352] : memref<1x2x9x2x4x9xf32, #tpu.memory_space<vmem>>, vector<1x1x1x1x4x8xf32>
      %145 = vector.shape_cast %144 : vector<1x1x1x1x4x8xf32> to vector<4x8xf32>
      %c20_353 = arith.constant 20 : index
      %c40_354 = arith.constant 40 : index
      %146 = vector.load %arg6[%c20_353, %c40_354] : memref<36x64xf32, #tpu.memory_space<vmem>>, vector<4x8xf32>
      tpu.vector_store %arg6[%c20_353, %c40_354], %145 {strides = array<i32>} : memref<36x64xf32, #tpu.memory_space<vmem>>, vector<4x8xf32>,
      %c0_355 = arith.constant 0 : index
      %c1_356 = arith.constant 1 : index
      %c6_357 = arith.constant 6 : index
      %c0_358 = arith.constant 0 : index
      %c0_359 = arith.constant 0 : index
      %c1_360 = arith.constant 1 : index
      %147 = vector.load %arg2[%c0_355, %c1_356, %c6_357, %c0_358, %c0_359, %c1_360] : memref<1x2x9x2x4x9xf32, #tpu.memory_space<vmem>>, vector<1x1x1x1x4x8xf32>
      %148 = vector.shape_cast %147 : vector<1x1x1x1x4x8xf32> to vector<4x8xf32>
      %c20_361 = arith.constant 20 : index
      %c48_362 = arith.constant 48 : index
      %149 = vector.load %arg6[%c20_361, %c48_362] : memref<36x64xf32, #tpu.memory_space<vmem>>, vector<4x8xf32>
      tpu.vector_store %arg6[%c20_361, %c48_362], %148 {strides = array<i32>} : memref<36x64xf32, #tpu.memory_space<vmem>>, vector<4x8xf32>,
      %c0_363 = arith.constant 0 : index
      %c1_364 = arith.constant 1 : index
      %c7_365 = arith.constant 7 : index
      %c0_366 = arith.constant 0 : index
      %c0_367 = arith.constant 0 : index
      %c1_368 = arith.constant 1 : index
      %150 = vector.load %arg2[%c0_363, %c1_364, %c7_365, %c0_366, %c0_367, %c1_368] : memref<1x2x9x2x4x9xf32, #tpu.memory_space<vmem>>, vector<1x1x1x1x4x8xf32>
      %151 = vector.shape_cast %150 : vector<1x1x1x1x4x8xf32> to vector<4x8xf32>
      %c20_369 = arith.constant 20 : index
      %c56_370 = arith.constant 56 : index
      %152 = vector.load %arg6[%c20_369, %c56_370] : memref<36x64xf32, #tpu.memory_space<vmem>>, vector<4x8xf32>
      tpu.vector_store %arg6[%c20_369, %c56_370], %151 {strides = array<i32>} : memref<36x64xf32, #tpu.memory_space<vmem>>, vector<4x8xf32>,
      %c0_371 = arith.constant 0 : index
      %c0_372 = arith.constant 0 : index
      %c1_373 = arith.constant 1 : index
      %c0_374 = arith.constant 0 : index
      %c0_375 = arith.constant 0 : index
      %c0_376 = arith.constant 0 : index
      %153 = vector.load %arg2[%c0_371, %c0_372, %c1_373, %c0_374, %c0_375, %c0_376] : memref<1x2x9x2x4x9xf32, #tpu.memory_space<vmem>>, vector<1x1x1x1x4x8xf32>
      %154 = vector.shape_cast %153 : vector<1x1x1x1x4x8xf32> to vector<4x8xf32>
      %c24_377 = arith.constant 24 : index
      %c0_378 = arith.constant 0 : index
      %155 = vector.load %arg6[%c24_377, %c0_378] : memref<36x64xf32, #tpu.memory_space<vmem>>, vector<4x8xf32>
      tpu.vector_store %arg6[%c24_377, %c0_378], %154 {strides = array<i32>} : memref<36x64xf32, #tpu.memory_space<vmem>>, vector<4x8xf32>,
      %c0_379 = arith.constant 0 : index
      %c0_380 = arith.constant 0 : index
      %c2_381 = arith.constant 2 : index
      %c0_382 = arith.constant 0 : index
      %c0_383 = arith.constant 0 : index
      %c0_384 = arith.constant 0 : index
      %156 = vector.load %arg2[%c0_379, %c0_380, %c2_381, %c0_382, %c0_383, %c0_384] : memref<1x2x9x2x4x9xf32, #tpu.memory_space<vmem>>, vector<1x1x1x1x4x8xf32>
      %157 = vector.shape_cast %156 : vector<1x1x1x1x4x8xf32> to vector<4x8xf32>
      %c24_385 = arith.constant 24 : index
      %c8_386 = arith.constant 8 : index
      %158 = vector.load %arg6[%c24_385, %c8_386] : memref<36x64xf32, #tpu.memory_space<vmem>>, vector<4x8xf32>
      tpu.vector_store %arg6[%c24_385, %c8_386], %157 {strides = array<i32>} : memref<36x64xf32, #tpu.memory_space<vmem>>, vector<4x8xf32>,
      %c0_387 = arith.constant 0 : index
      %c0_388 = arith.constant 0 : index
      %c3_389 = arith.constant 3 : index
      %c0_390 = arith.constant 0 : index
      %c0_391 = arith.constant 0 : index
      %c0_392 = arith.constant 0 : index
      %159 = vector.load %arg2[%c0_387, %c0_388, %c3_389, %c0_390, %c0_391, %c0_392] : memref<1x2x9x2x4x9xf32, #tpu.memory_space<vmem>>, vector<1x1x1x1x4x8xf32>
      %160 = vector.shape_cast %159 : vector<1x1x1x1x4x8xf32> to vector<4x8xf32>
      %c24_393 = arith.constant 24 : index
      %c16_394 = arith.constant 16 : index
      %161 = vector.load %arg6[%c24_393, %c16_394] : memref<36x64xf32, #tpu.memory_space<vmem>>, vector<4x8xf32>
      tpu.vector_store %arg6[%c24_393, %c16_394], %160 {strides = array<i32>} : memref<36x64xf32, #tpu.memory_space<vmem>>, vector<4x8xf32>,
      %c0_395 = arith.constant 0 : index
      %c0_396 = arith.constant 0 : index
      %c4_397 = arith.constant 4 : index
      %c0_398 = arith.constant 0 : index
      %c0_399 = arith.constant 0 : index
      %c0_400 = arith.constant 0 : index
      %162 = vector.load %arg2[%c0_395, %c0_396, %c4_397, %c0_398, %c0_399, %c0_400] : memref<1x2x9x2x4x9xf32, #tpu.memory_space<vmem>>, vector<1x1x1x1x4x8xf32>
      %163 = vector.shape_cast %162 : vector<1x1x1x1x4x8xf32> to vector<4x8xf32>
      %c24_401 = arith.constant 24 : index
      %c24_402 = arith.constant 24 : index
      %164 = vector.load %arg6[%c24_401, %c24_402] : memref<36x64xf32, #tpu.memory_space<vmem>>, vector<4x8xf32>
      tpu.vector_store %arg6[%c24_401, %c24_402], %163 {strides = array<i32>} : memref<36x64xf32, #tpu.memory_space<vmem>>, vector<4x8xf32>,
      %c0_403 = arith.constant 0 : index
      %c0_404 = arith.constant 0 : index
      %c5_405 = arith.constant 5 : index
      %c0_406 = arith.constant 0 : index
      %c0_407 = arith.constant 0 : index
      %c0_408 = arith.constant 0 : index
      %165 = vector.load %arg2[%c0_403, %c0_404, %c5_405, %c0_406, %c0_407, %c0_408] : memref<1x2x9x2x4x9xf32, #tpu.memory_space<vmem>>, vector<1x1x1x1x4x8xf32>
      %166 = vector.shape_cast %165 : vector<1x1x1x1x4x8xf32> to vector<4x8xf32>
      %c24_409 = arith.constant 24 : index
      %c32_410 = arith.constant 32 : index
      %167 = vector.load %arg6[%c24_409, %c32_410] : memref<36x64xf32, #tpu.memory_space<vmem>>, vector<4x8xf32>
      tpu.vector_store %arg6[%c24_409, %c32_410], %166 {strides = array<i32>} : memref<36x64xf32, #tpu.memory_space<vmem>>, vector<4x8xf32>,
      %c0_411 = arith.constant 0 : index
      %c0_412 = arith.constant 0 : index
      %c6_413 = arith.constant 6 : index
      %c0_414 = arith.constant 0 : index
      %c0_415 = arith.constant 0 : index
      %c0_416 = arith.constant 0 : index
      %168 = vector.load %arg2[%c0_411, %c0_412, %c6_413, %c0_414, %c0_415, %c0_416] : memref<1x2x9x2x4x9xf32, #tpu.memory_space<vmem>>, vector<1x1x1x1x4x8xf32>
      %169 = vector.shape_cast %168 : vector<1x1x1x1x4x8xf32> to vector<4x8xf32>
      %c24_417 = arith.constant 24 : index
      %c40_418 = arith.constant 40 : index
      %170 = vector.load %arg6[%c24_417, %c40_418] : memref<36x64xf32, #tpu.memory_space<vmem>>, vector<4x8xf32>
      tpu.vector_store %arg6[%c24_417, %c40_418], %169 {strides = array<i32>} : memref<36x64xf32, #tpu.memory_space<vmem>>, vector<4x8xf32>,
      %c0_419 = arith.constant 0 : index
      %c0_420 = arith.constant 0 : index
      %c7_421 = arith.constant 7 : index
      %c0_422 = arith.constant 0 : index
      %c0_423 = arith.constant 0 : index
      %c0_424 = arith.constant 0 : index
      %171 = vector.load %arg2[%c0_419, %c0_420, %c7_421, %c0_422, %c0_423, %c0_424] : memref<1x2x9x2x4x9xf32, #tpu.memory_space<vmem>>, vector<1x1x1x1x4x8xf32>
      %172 = vector.shape_cast %171 : vector<1x1x1x1x4x8xf32> to vector<4x8xf32>
      %c24_425 = arith.constant 24 : index
      %c48_426 = arith.constant 48 : index
      %173 = vector.load %arg6[%c24_425, %c48_426] : memref<36x64xf32, #tpu.memory_space<vmem>>, vector<4x8xf32>
      tpu.vector_store %arg6[%c24_425, %c48_426], %172 {strides = array<i32>} : memref<36x64xf32, #tpu.memory_space<vmem>>, vector<4x8xf32>,
      %c0_427 = arith.constant 0 : index
      %c0_428 = arith.constant 0 : index
      %c8_429 = arith.constant 8 : index
      %c0_430 = arith.constant 0 : index
      %c0_431 = arith.constant 0 : index
      %c0_432 = arith.constant 0 : index
      %174 = vector.load %arg2[%c0_427, %c0_428, %c8_429, %c0_430, %c0_431, %c0_432] : memref<1x2x9x2x4x9xf32, #tpu.memory_space<vmem>>, vector<1x1x1x1x4x8xf32>
      %175 = vector.shape_cast %174 : vector<1x1x1x1x4x8xf32> to vector<4x8xf32>
      %c24_433 = arith.constant 24 : index
      %c56_434 = arith.constant 56 : index
      %176 = vector.load %arg6[%c24_433, %c56_434] : memref<36x64xf32, #tpu.memory_space<vmem>>, vector<4x8xf32>
      tpu.vector_store %arg6[%c24_433, %c56_434], %175 {strides = array<i32>} : memref<36x64xf32, #tpu.memory_space<vmem>>, vector<4x8xf32>,
      %c0_435 = arith.constant 0 : index
      %c0_436 = arith.constant 0 : index
      %c1_437 = arith.constant 1 : index
      %c1_438 = arith.constant 1 : index
      %c0_439 = arith.constant 0 : index
      %c0_440 = arith.constant 0 : index
      %177 = vector.load %arg2[%c0_435, %c0_436, %c1_437, %c1_438, %c0_439, %c0_440] : memref<1x2x9x2x4x9xf32, #tpu.memory_space<vmem>>, vector<1x1x1x1x4x8xf32>
      %178 = vector.shape_cast %177 : vector<1x1x1x1x4x8xf32> to vector<4x8xf32>
      %c28 = arith.constant 28 : index
      %c0_441 = arith.constant 0 : index
      %179 = vector.load %arg6[%c28, %c0_441] : memref<36x64xf32, #tpu.memory_space<vmem>>, vector<4x8xf32>
      tpu.vector_store %arg6[%c28, %c0_441], %178 {strides = array<i32>} : memref<36x64xf32, #tpu.memory_space<vmem>>, vector<4x8xf32>,
      %c0_442 = arith.constant 0 : index
      %c0_443 = arith.constant 0 : index
      %c2_444 = arith.constant 2 : index
      %c1_445 = arith.constant 1 : index
      %c0_446 = arith.constant 0 : index
      %c0_447 = arith.constant 0 : index
      %180 = vector.load %arg2[%c0_442, %c0_443, %c2_444, %c1_445, %c0_446, %c0_447] : memref<1x2x9x2x4x9xf32, #tpu.memory_space<vmem>>, vector<1x1x1x1x4x8xf32>
      %181 = vector.shape_cast %180 : vector<1x1x1x1x4x8xf32> to vector<4x8xf32>
      %c28_448 = arith.constant 28 : index
      %c8_449 = arith.constant 8 : index
      %182 = vector.load %arg6[%c28_448, %c8_449] : memref<36x64xf32, #tpu.memory_space<vmem>>, vector<4x8xf32>
      tpu.vector_store %arg6[%c28_448, %c8_449], %181 {strides = array<i32>} : memref<36x64xf32, #tpu.memory_space<vmem>>, vector<4x8xf32>,
      %c0_450 = arith.constant 0 : index
      %c0_451 = arith.constant 0 : index
      %c3_452 = arith.constant 3 : index
      %c1_453 = arith.constant 1 : index
      %c0_454 = arith.constant 0 : index
      %c0_455 = arith.constant 0 : index
      %183 = vector.load %arg2[%c0_450, %c0_451, %c3_452, %c1_453, %c0_454, %c0_455] : memref<1x2x9x2x4x9xf32, #tpu.memory_space<vmem>>, vector<1x1x1x1x4x8xf32>
      %184 = vector.shape_cast %183 : vector<1x1x1x1x4x8xf32> to vector<4x8xf32>
      %c28_456 = arith.constant 28 : index
      %c16_457 = arith.constant 16 : index
      %185 = vector.load %arg6[%c28_456, %c16_457] : memref<36x64xf32, #tpu.memory_space<vmem>>, vector<4x8xf32>
      tpu.vector_store %arg6[%c28_456, %c16_457], %184 {strides = array<i32>} : memref<36x64xf32, #tpu.memory_space<vmem>>, vector<4x8xf32>,
      %c0_458 = arith.constant 0 : index
      %c0_459 = arith.constant 0 : index
      %c4_460 = arith.constant 4 : index
      %c1_461 = arith.constant 1 : index
      %c0_462 = arith.constant 0 : index
      %c0_463 = arith.constant 0 : index
      %186 = vector.load %arg2[%c0_458, %c0_459, %c4_460, %c1_461, %c0_462, %c0_463] : memref<1x2x9x2x4x9xf32, #tpu.memory_space<vmem>>, vector<1x1x1x1x4x8xf32>
      %187 = vector.shape_cast %186 : vector<1x1x1x1x4x8xf32> to vector<4x8xf32>
      %c28_464 = arith.constant 28 : index
      %c24_465 = arith.constant 24 : index
      %188 = vector.load %arg6[%c28_464, %c24_465] : memref<36x64xf32, #tpu.memory_space<vmem>>, vector<4x8xf32>
      tpu.vector_store %arg6[%c28_464, %c24_465], %187 {strides = array<i32>} : memref<36x64xf32, #tpu.memory_space<vmem>>, vector<4x8xf32>,
      %c0_466 = arith.constant 0 : index
      %c0_467 = arith.constant 0 : index
      %c5_468 = arith.constant 5 : index
      %c1_469 = arith.constant 1 : index
      %c0_470 = arith.constant 0 : index
      %c0_471 = arith.constant 0 : index
      %189 = vector.load %arg2[%c0_466, %c0_467, %c5_468, %c1_469, %c0_470, %c0_471] : memref<1x2x9x2x4x9xf32, #tpu.memory_space<vmem>>, vector<1x1x1x1x4x8xf32>
      %190 = vector.shape_cast %189 : vector<1x1x1x1x4x8xf32> to vector<4x8xf32>
      %c28_472 = arith.constant 28 : index
      %c32_473 = arith.constant 32 : index
      %191 = vector.load %arg6[%c28_472, %c32_473] : memref<36x64xf32, #tpu.memory_space<vmem>>, vector<4x8xf32>
      tpu.vector_store %arg6[%c28_472, %c32_473], %190 {strides = array<i32>} : memref<36x64xf32, #tpu.memory_space<vmem>>, vector<4x8xf32>,
      %c0_474 = arith.constant 0 : index
      %c0_475 = arith.constant 0 : index
      %c6_476 = arith.constant 6 : index
      %c1_477 = arith.constant 1 : index
      %c0_478 = arith.constant 0 : index
      %c0_479 = arith.constant 0 : index
      %192 = vector.load %arg2[%c0_474, %c0_475, %c6_476, %c1_477, %c0_478, %c0_479] : memref<1x2x9x2x4x9xf32, #tpu.memory_space<vmem>>, vector<1x1x1x1x4x8xf32>
      %193 = vector.shape_cast %192 : vector<1x1x1x1x4x8xf32> to vector<4x8xf32>
      %c28_480 = arith.constant 28 : index
      %c40_481 = arith.constant 40 : index
      %194 = vector.load %arg6[%c28_480, %c40_481] : memref<36x64xf32, #tpu.memory_space<vmem>>, vector<4x8xf32>
      tpu.vector_store %arg6[%c28_480, %c40_481], %193 {strides = array<i32>} : memref<36x64xf32, #tpu.memory_space<vmem>>, vector<4x8xf32>,
      %c0_482 = arith.constant 0 : index
      %c0_483 = arith.constant 0 : index
      %c7_484 = arith.constant 7 : index
      %c1_485 = arith.constant 1 : index
      %c0_486 = arith.constant 0 : index
      %c0_487 = arith.constant 0 : index
      %195 = vector.load %arg2[%c0_482, %c0_483, %c7_484, %c1_485, %c0_486, %c0_487] : memref<1x2x9x2x4x9xf32, #tpu.memory_space<vmem>>, vector<1x1x1x1x4x8xf32>
      %196 = vector.shape_cast %195 : vector<1x1x1x1x4x8xf32> to vector<4x8xf32>
      %c28_488 = arith.constant 28 : index
      %c48_489 = arith.constant 48 : index
      %197 = vector.load %arg6[%c28_488, %c48_489] : memref<36x64xf32, #tpu.memory_space<vmem>>, vector<4x8xf32>
      tpu.vector_store %arg6[%c28_488, %c48_489], %196 {strides = array<i32>} : memref<36x64xf32, #tpu.memory_space<vmem>>, vector<4x8xf32>,
      %c0_490 = arith.constant 0 : index
      %c0_491 = arith.constant 0 : index
      %c8_492 = arith.constant 8 : index
      %c1_493 = arith.constant 1 : index
      %c0_494 = arith.constant 0 : index
      %c0_495 = arith.constant 0 : index
      %198 = vector.load %arg2[%c0_490, %c0_491, %c8_492, %c1_493, %c0_494, %c0_495] : memref<1x2x9x2x4x9xf32, #tpu.memory_space<vmem>>, vector<1x1x1x1x4x8xf32>
      %199 = vector.shape_cast %198 : vector<1x1x1x1x4x8xf32> to vector<4x8xf32>
      %c28_496 = arith.constant 28 : index
      %c56_497 = arith.constant 56 : index
      %200 = vector.load %arg6[%c28_496, %c56_497] : memref<36x64xf32, #tpu.memory_space<vmem>>, vector<4x8xf32>
      tpu.vector_store %arg6[%c28_496, %c56_497], %199 {strides = array<i32>} : memref<36x64xf32, #tpu.memory_space<vmem>>, vector<4x8xf32>,
      %c0_498 = arith.constant 0 : index
      %c0_499 = arith.constant 0 : index
      %c1_500 = arith.constant 1 : index
      %c0_501 = arith.constant 0 : index
      %c0_502 = arith.constant 0 : index
      %c1_503 = arith.constant 1 : index
      %201 = vector.load %arg2[%c0_498, %c0_499, %c1_500, %c0_501, %c0_502, %c1_503] : memref<1x2x9x2x4x9xf32, #tpu.memory_space<vmem>>, vector<1x1x1x1x4x8xf32>
      %202 = vector.shape_cast %201 : vector<1x1x1x1x4x8xf32> to vector<4x8xf32>
      %c32_504 = arith.constant 32 : index
      %c0_505 = arith.constant 0 : index
      %203 = vector.load %arg6[%c32_504, %c0_505] : memref<36x64xf32, #tpu.memory_space<vmem>>, vector<4x8xf32>
      tpu.vector_store %arg6[%c32_504, %c0_505], %202 {strides = array<i32>} : memref<36x64xf32, #tpu.memory_space<vmem>>, vector<4x8xf32>,
      %c0_506 = arith.constant 0 : index
      %c0_507 = arith.constant 0 : index
      %c2_508 = arith.constant 2 : index
      %c0_509 = arith.constant 0 : index
      %c0_510 = arith.constant 0 : index
      %c1_511 = arith.constant 1 : index
      %204 = vector.load %arg2[%c0_506, %c0_507, %c2_508, %c0_509, %c0_510, %c1_511] : memref<1x2x9x2x4x9xf32, #tpu.memory_space<vmem>>, vector<1x1x1x1x4x8xf32>
      %205 = vector.shape_cast %204 : vector<1x1x1x1x4x8xf32> to vector<4x8xf32>
      %c32_512 = arith.constant 32 : index
      %c8_513 = arith.constant 8 : index
      %206 = vector.load %arg6[%c32_512, %c8_513] : memref<36x64xf32, #tpu.memory_space<vmem>>, vector<4x8xf32>
      tpu.vector_store %arg6[%c32_512, %c8_513], %205 {strides = array<i32>} : memref<36x64xf32, #tpu.memory_space<vmem>>, vector<4x8xf32>,
      %c0_514 = arith.constant 0 : index
      %c0_515 = arith.constant 0 : index
      %c3_516 = arith.constant 3 : index
      %c0_517 = arith.constant 0 : index
      %c0_518 = arith.constant 0 : index
      %c1_519 = arith.constant 1 : index
      %207 = vector.load %arg2[%c0_514, %c0_515, %c3_516, %c0_517, %c0_518, %c1_519] : memref<1x2x9x2x4x9xf32, #tpu.memory_space<vmem>>, vector<1x1x1x1x4x8xf32>
      %208 = vector.shape_cast %207 : vector<1x1x1x1x4x8xf32> to vector<4x8xf32>
      %c32_520 = arith.constant 32 : index
      %c16_521 = arith.constant 16 : index
      %209 = vector.load %arg6[%c32_520, %c16_521] : memref<36x64xf32, #tpu.memory_space<vmem>>, vector<4x8xf32>
      tpu.vector_store %arg6[%c32_520, %c16_521], %208 {strides = array<i32>} : memref<36x64xf32, #tpu.memory_space<vmem>>, vector<4x8xf32>,
      %c0_522 = arith.constant 0 : index
      %c0_523 = arith.constant 0 : index
      %c4_524 = arith.constant 4 : index
      %c0_525 = arith.constant 0 : index
      %c0_526 = arith.constant 0 : index
      %c1_527 = arith.constant 1 : index
      %210 = vector.load %arg2[%c0_522, %c0_523, %c4_524, %c0_525, %c0_526, %c1_527] : memref<1x2x9x2x4x9xf32, #tpu.memory_space<vmem>>, vector<1x1x1x1x4x8xf32>
      %211 = vector.shape_cast %210 : vector<1x1x1x1x4x8xf32> to vector<4x8xf32>
      %c32_528 = arith.constant 32 : index
      %c24_529 = arith.constant 24 : index
      %212 = vector.load %arg6[%c32_528, %c24_529] : memref<36x64xf32, #tpu.memory_space<vmem>>, vector<4x8xf32>
      tpu.vector_store %arg6[%c32_528, %c24_529], %211 {strides = array<i32>} : memref<36x64xf32, #tpu.memory_space<vmem>>, vector<4x8xf32>,
      %c0_530 = arith.constant 0 : index
      %c0_531 = arith.constant 0 : index
      %c5_532 = arith.constant 5 : index
      %c0_533 = arith.constant 0 : index
      %c0_534 = arith.constant 0 : index
      %c1_535 = arith.constant 1 : index
      %213 = vector.load %arg2[%c0_530, %c0_531, %c5_532, %c0_533, %c0_534, %c1_535] : memref<1x2x9x2x4x9xf32, #tpu.memory_space<vmem>>, vector<1x1x1x1x4x8xf32>
      %214 = vector.shape_cast %213 : vector<1x1x1x1x4x8xf32> to vector<4x8xf32>
      %c32_536 = arith.constant 32 : index
      %c32_537 = arith.constant 32 : index
      %215 = vector.load %arg6[%c32_536, %c32_537] : memref<36x64xf32, #tpu.memory_space<vmem>>, vector<4x8xf32>
      tpu.vector_store %arg6[%c32_536, %c32_537], %214 {strides = array<i32>} : memref<36x64xf32, #tpu.memory_space<vmem>>, vector<4x8xf32>,
      %c0_538 = arith.constant 0 : index
      %c0_539 = arith.constant 0 : index
      %c6_540 = arith.constant 6 : index
      %c0_541 = arith.constant 0 : index
      %c0_542 = arith.constant 0 : index
      %c1_543 = arith.constant 1 : index
      %216 = vector.load %arg2[%c0_538, %c0_539, %c6_540, %c0_541, %c0_542, %c1_543] : memref<1x2x9x2x4x9xf32, #tpu.memory_space<vmem>>, vector<1x1x1x1x4x8xf32>
      %217 = vector.shape_cast %216 : vector<1x1x1x1x4x8xf32> to vector<4x8xf32>
      %c32_544 = arith.constant 32 : index
      %c40_545 = arith.constant 40 : index
      %218 = vector.load %arg6[%c32_544, %c40_545] : memref<36x64xf32, #tpu.memory_space<vmem>>, vector<4x8xf32>
      tpu.vector_store %arg6[%c32_544, %c40_545], %217 {strides = array<i32>} : memref<36x64xf32, #tpu.memory_space<vmem>>, vector<4x8xf32>,
      %c0_546 = arith.constant 0 : index
      %c0_547 = arith.constant 0 : index
      %c7_548 = arith.constant 7 : index
      %c0_549 = arith.constant 0 : index
      %c0_550 = arith.constant 0 : index
      %c1_551 = arith.constant 1 : index
      %219 = vector.load %arg2[%c0_546, %c0_547, %c7_548, %c0_549, %c0_550, %c1_551] : memref<1x2x9x2x4x9xf32, #tpu.memory_space<vmem>>, vector<1x1x1x1x4x8xf32>
      %220 = vector.shape_cast %219 : vector<1x1x1x1x4x8xf32> to vector<4x8xf32>
      %c32_552 = arith.constant 32 : index
      %c48_553 = arith.constant 48 : index
      %221 = vector.load %arg6[%c32_552, %c48_553] : memref<36x64xf32, #tpu.memory_space<vmem>>, vector<4x8xf32>
      tpu.vector_store %arg6[%c32_552, %c48_553], %220 {strides = array<i32>} : memref<36x64xf32, #tpu.memory_space<vmem>>, vector<4x8xf32>,
      %c0_554 = arith.constant 0 : index
      %c0_555 = arith.constant 0 : index
      %c8_556 = arith.constant 8 : index
      %c0_557 = arith.constant 0 : index
      %c0_558 = arith.constant 0 : index
      %c1_559 = arith.constant 1 : index
      %222 = vector.load %arg2[%c0_554, %c0_555, %c8_556, %c0_557, %c0_558, %c1_559] : memref<1x2x9x2x4x9xf32, #tpu.memory_space<vmem>>, vector<1x1x1x1x4x8xf32>
      %223 = vector.shape_cast %222 : vector<1x1x1x1x4x8xf32> to vector<4x8xf32>
      %c32_560 = arith.constant 32 : index
      %c56_561 = arith.constant 56 : index
      %224 = vector.load %arg6[%c32_560, %c56_561] : memref<36x64xf32, #tpu.memory_space<vmem>>, vector<4x8xf32>
      tpu.vector_store %arg6[%c32_560, %c56_561], %223 {strides = array<i32>} : memref<36x64xf32, #tpu.memory_space<vmem>>, vector<4x8xf32>,
      %c0_562 = arith.constant 0 : index
      %c0_563 = arith.constant 0 : index
      %225 = vector.load %arg3[%c0_562, %c0_563] : memref<8x36xf32, #tpu.memory_space<vmem>>, vector<8x36xf32>
      %c0_564 = arith.constant 0 : index
      %c0_565 = arith.constant 0 : index
      %226 = vector.load %arg6[%c0_564, %c0_565] : memref<36x64xf32, #tpu.memory_space<vmem>>, vector<36x64xf32>
      %cst = arith.constant dense<0.000000e+00> : vector<8x64xf32>
      %227 = tpu.matmul %225, %226, %cst {dimension_numbers = #tpu.dot_dimension_numbers<[1], [0], [0], [1], [0, 0, 1, 1], [], []>} : vector<8x36xf32>, vector<36x64xf32>, vector<8x64xf32> -> vector<8x64xf32>
      %228 = arith.index_cast %arg1 : i32 to index
      %c0_566 = arith.constant 0 : index
      %c0_567 = arith.constant 0 : index
      %229 = vector.load %arg7[%228, %c0_566, %c0_567] : memref<2x8x64xf32, #tpu.memory_space<vmem>>, vector<1x8x64xf32>
      %230 = vector.shape_cast %229 : vector<1x8x64xf32> to vector<8x64xf32>
      %231 = vector.shape_cast %227 : vector<8x64xf32> to vector<1x8x64xf32>
      tpu.vector_store %arg7[%228, %c0_566, %c0_567], %231 {strides = array<i32>} : memref<2x8x64xf32, #tpu.memory_space<vmem>>, vector<1x8x64xf32>,
      %c0_568 = arith.constant 0 : index
      %c0_569 = arith.constant 0 : index
      %232 = vector.load %arg8[%c0_568, %c0_569] : memref<8x2xf32, #tpu.memory_space<vmem>>, vector<8x1xf32>
      %cst_570 = arith.constant dense<0.000000e+00> : vector<8xf32>
      %233 = vector.multi_reduction <add>, %227, %cst_570 [1] : vector<8x64xf32> to vector<8xf32>
      %234 = vector.shape_cast %233 : vector<8xf32> to vector<8x1xf32>
      %235 = arith.addf %232, %234 : vector<8x1xf32>
      %c0_571 = arith.constant 0 : index
      %c0_572 = arith.constant 0 : index
      %236 = vector.load %arg8[%c0_571, %c0_572] : memref<8x2xf32, #tpu.memory_space<vmem>>, vector<8x1xf32>
      tpu.vector_store %arg8[%c0_571, %c0_572], %235 {strides = array<i32>} : memref<8x2xf32, #tpu.memory_space<vmem>>, vector<8x1xf32>,
      %c0_573 = arith.constant 0 : index
      %c1_574 = arith.constant 1 : index
      %237 = vector.load %arg8[%c0_573, %c1_574] : memref<8x2xf32, #tpu.memory_space<vmem>>, vector<8x1xf32>
      %238 = arith.mulf %227, %227 : vector<8x64xf32>
      %cst_575 = arith.constant dense<0.000000e+00> : vector<8xf32>
      %239 = vector.multi_reduction <add>, %238, %cst_575 [1] : vector<8x64xf32> to vector<8xf32>
      %240 = vector.shape_cast %239 : vector<8xf32> to vector<8x1xf32>
      %241 = arith.addf %237, %240 : vector<8x1xf32>
      %c0_576 = arith.constant 0 : index
      %c1_577 = arith.constant 1 : index
      %242 = vector.load %arg8[%c0_576, %c1_577] : memref<8x2xf32, #tpu.memory_space<vmem>>, vector<8x1xf32>
      tpu.vector_store %arg8[%c0_576, %c1_577], %241 {strides = array<i32>} : memref<8x2xf32, #tpu.memory_space<vmem>>, vector<8x1xf32>,
    } else {
    }
    %c1_i32 = arith.constant 1 : i32
    %3 = arith.cmpi eq, %arg0, %c1_i32 : i32
    %4 = arith.extui %3 : i1 to i32
    %c0_i32_1 = arith.constant 0 : i32
    %5 = arith.cmpi ne, %4, %c0_i32_1 : i32
    scf.if %5 {
      %c0 = arith.constant 0 : index
      %c0_2 = arith.constant 0 : index
      %6 = vector.load %arg8[%c0, %c0_2] : memref<8x2xf32, #tpu.memory_space<vmem>>, vector<8x1xf32>
      %cst = arith.constant 7.812500e-03 : f32
      %7 = vector.broadcast %cst : f32 to vector<8x1xf32>
      %8 = arith.mulf %6, %7 : vector<8x1xf32>
      %c0_3 = arith.constant 0 : index
      %c1 = arith.constant 1 : index
      %9 = vector.load %arg8[%c0_3, %c1] : memref<8x2xf32, #tpu.memory_space<vmem>>, vector<8x1xf32>
      %cst_4 = arith.constant 7.812500e-03 : f32
      %10 = vector.broadcast %cst_4 : f32 to vector<8x1xf32>
      %11 = arith.mulf %9, %10 : vector<8x1xf32>
      %12 = arith.mulf %8, %8 : vector<8x1xf32>
      %13 = arith.subf %11, %12 : vector<8x1xf32>
      %cst_5 = arith.constant 0.000000e+00 : f32
      %14 = vector.broadcast %cst_5 : f32 to vector<8x1xf32>
      %15 = arith.maximumf %13, %14 : vector<8x1xf32>
      %cst_6 = arith.constant 9.99999974E-6 : f32
      %16 = vector.broadcast %cst_6 : f32 to vector<8x1xf32>
      %17 = arith.addf %15, %16 : vector<8x1xf32>
      %18 = math.rsqrt %17 : vector<8x1xf32>
      %c0_7 = arith.constant 0 : index
      %c0_8 = arith.constant 0 : index
      %19 = vector.load %arg4[%c0_7, %c0_8] : memref<8x2xf32, #tpu.memory_space<vmem>>, vector<8x1xf32>
      %20 = arith.mulf %18, %19 : vector<8x1xf32>
      %c0_9 = arith.constant 0 : index
      %c1_10 = arith.constant 1 : index
      %21 = vector.load %arg4[%c0_9, %c1_10] : memref<8x2xf32, #tpu.memory_space<vmem>>, vector<8x1xf32>
      %22 = arith.mulf %8, %20 : vector<8x1xf32>
      %23 = arith.subf %21, %22 : vector<8x1xf32>
      %24 = arith.index_cast %arg1 : i32 to index
      %c0_11 = arith.constant 0 : index
      %c0_12 = arith.constant 0 : index
      %25 = vector.load %arg7[%24, %c0_11, %c0_12] : memref<2x8x64xf32, #tpu.memory_space<vmem>>, vector<1x8x64xf32>
      %26 = vector.shape_cast %25 : vector<1x8x64xf32> to vector<8x64xf32>
      %27 = vector.broadcast %20 : vector<8x1xf32> to vector<8x64xf32>
      %28 = arith.mulf %26, %27 : vector<8x64xf32>
      %29 = vector.broadcast %23 : vector<8x1xf32> to vector<8x64xf32>
      %30 = arith.addf %28, %29 : vector<8x64xf32>
      %cst_13 = arith.constant 0.000000e+00 : f32
      %31 = vector.broadcast %cst_13 : f32 to vector<8x64xf32>
      %32 = arith.maximumf %30, %31 : vector<8x64xf32>
      %c0_14 = arith.constant 0 : index
      %c0_15 = arith.constant 0 : index
      %c0_16 = arith.constant 0 : index
      %33 = vector.load %arg5[%c0_14, %c0_15, %c0_16] : memref<1x8x64xf32, #tpu.memory_space<vmem>>, vector<1x8x64xf32>
      %34 = vector.shape_cast %33 : vector<1x8x64xf32> to vector<8x64xf32>
      %35 = vector.shape_cast %32 : vector<8x64xf32> to vector<1x8x64xf32>
      tpu.vector_store %arg5[%c0_14, %c0_15, %c0_16], %35 {strides = array<i32>} : memref<1x8x64xf32, #tpu.memory_space<vmem>>, vector<1x8x64xf32>,
    } else {
    }
    return
  }
  func.func @transform_0(%arg0: i32, %arg1: i32) -> (i32, i32, i32, i32, i32, i32) {
    %c0_i32 = arith.constant 0 : i32
    %c0_i32_0 = arith.constant 0 : i32
    %c0_i32_1 = arith.constant 0 : i32
    %c0_i32_2 = arith.constant 0 : i32
    %c0_i32_3 = arith.constant 0 : i32
    %c0_i32_4 = arith.constant 0 : i32
    return %arg1, %c0_i32, %c0_i32_0, %c0_i32_1, %c0_i32_2, %c0_i32_3 : i32, i32, i32, i32, i32, i32
  }
  func.func @transform_1(%arg0: i32, %arg1: i32) -> (i32, i32) {
    %c0_i32 = arith.constant 0 : i32
    %c0_i32_0 = arith.constant 0 : i32
    %c0_i32_1 = arith.constant 0 : i32
    return %c0_i32, %c0_i32_0 : i32, i32
  }
  func.func @transform_2(%arg0: i32, %arg1: i32) -> (i32, i32) {
    %c0_i32 = arith.constant 0 : i32
    %c0_i32_0 = arith.constant 0 : i32
    %c0_i32_1 = arith.constant 0 : i32
    return %c0_i32, %c0_i32_0 : i32, i32
  }
  func.func @transform_3(%arg0: i32, %arg1: i32) -> (i32, i32, i32) {
    %0 = arith.muli %arg1, %arg0 : i32
    %c0_i32 = arith.constant 0 : i32
    %c0_i32_0 = arith.constant 0 : i32
    %c0_i32_1 = arith.constant 0 : i32
    return %0, %c0_i32, %c0_i32_0 : i32, i32, i32
  }
}

</mosaic_0001>

<bundles_post_ra>
// kernel: down_block2d.1
= control target key start
LH: loop header
LB: loop body
LE: loop exit
PB: predicated region body
PF: predicated region fallthrough
CT: control target
= control target key end

     0   :  { %s1120_s12 = smov 0   ;;  %s1122_s13 = smov 0   ;;  %s1411_s0 = inlined_call_operand.vmem [shape: f32[2,2,9,2,4,9], index: 0, kind: input, shape index: {}]   ;;  %s1412_s1 = inlined_call_operand.vmem [shape: f32[8,36], index: 1, kind: input, shape index: {}]   ;;  %s1413_s2 = inlined_call_operand.vmem [shape: f32[8,2], index: 2, kind: input, shape index: {}]   ;;  %s1414_s3 = inlined_call_operand.vmem [shape: f32[2,8,64], index: 3, kind: output, shape index: {}]  }
   0x1   :  { %s1124_s14 = smov 0   ;;  %s1126_s15 = smov 0  }
   0x2   :  { %s1128_s16 = smov 0  }
   0x3 LB: > { %s22_s17 = sadd.s32 1, %s1069_s14  ;;  %s25_s18 = sadd.s32 1, %s1073_s15  ;;  %s1077_s16 = sphi %s1128_s16, %s13_s16   ;;  %s1073_s15 = sphi %s1126_s15, %s1418_s15   ;;  %s1069_s14 = sphi %s1124_s14, %s1417_s14   ;;  %s1065_s13 = sphi %s1122_s13, %s1416_s13   ;;  %s1061_s12 = sphi %s1120_s12, %s1415_s12  }
   0x4   : > { %p23_p0 = scmp.ge.s32.totalorder %s22_s17, 2  ;;  %p872_p1 = scmp.ge.s32.totalorder %s1077_s16, 1 }
   0x5   : > { %p151_p2 = scmp.lt.s32.totalorder %s1077_s16, 5 }
   0x6   : > { %s1420_s17 = smov (%p23_p0, %s22_s17), 0  ;;  %s1422_s18 = smov (!%p23_p0, %s25_s18), %s1073_s15 }
   0x7   : > { %p152_p3 = pnand %p872_p1, %p151_p2  ;;  %p27_p4 = scmp.ge.s32.totalorder %s1422_s18, 2 }
   0x8   : > { %p175_p5 = scmp.lt.s32.totalorder (!%p152_p3), %s1061_s12, 1  ;;  %s180_s19 = smul.u32 (!%p152_p3), %s1061_s12, %s1065_s13 }
   0x9   : > { %s1424_s18 = smov (%p27_p4, %s1422_s18), 0  ;;  %155 = sbr.rel (%p152_p3) target bundleno = 1137 (0x471), region = 32 }
   0xa   : > { %p181_p6 = scmp.lt.s32.totalorder (!%p152_p3), %s180_s19, 1  ;;  %p875_p7 = scmp.ne.s32.totalorder (!%p152_p3), %s1065_s13, 0 }
   0xe   : > { %s176_s20 = scalar_select %p175_p5, %s1061_s12, 1 }
   0xf   : > { %s1426_s19 = smov (!%p181_p6, %s180_s19), 1  ;;  %189 = sbr.rel (%p875_p7) target bundleno = 625 (0x271), region = 36 }
  0x10   : > { %s973_s21 = smul.u32 144, %s176_s20  ;;  %s874_s25 = sshll.u32 %s1426_s19, 3 }
  0x11   : > { %s1166_s28 = scalar_lea.vmem %s1414_s3, %s874_s25  ;;  %p876_p8 = scmp.ne.s32.totalorder (!%p875_p7), %s1061_s12, 0 }
  0x12   : > { %s1161_s24 = scalar_lea.vmem %s1411_s0, %s973_s21 }
  0x14   : > { %193 = sbr.rel (%p876_p8) target bundleno = 27 (0x1b), region = 40 }
  0x19   : > { %vm194_vm0 = vcmask 15360   ;;  %v1079_v0 = vmov 0.0  }
  0x1a   : > { %195 = vst.msk [vmem:[#allocation4] sm:$0xff] %vm194_vm0, %v1079_v0 }
  0x1b PF: > { %v941_v1 = vld [vmem:[%s1161_s24 + $0x18] sm:$0xf]  ;;  %v939_v2 = vld [vmem:[%s1161_s24 + $0x8] sm:$0xf]  ;;  %s1080_s29 = smov 15   ;;  %s1081_s30 = smov 127  }
  0x1c   : > { %611 = vrot.lane.b32.xlu1 %v941_v1, %s1080_s29  ;;  %599 = vrot.lane.b32.xlu0 %v939_v2, %s1081_s30  ;;  %v940_v3 = vld [vmem:[%s1161_s24 + $0x10] sm:$0xf]  ;;  %s1082_s4 = smov 7   ;;  %s1083_s5 = smov 8   ;;  %v932_v5 = vld [vmem:[%s1161_s24 + $0x14] sm:$0xf] }
  0x1d   : > { %v924_v4 = vld [vmem:[%s1161_s24 + $0x10] sm:$0xf]  ;;  %v942_v6 = vld [vmem:[%s1161_s24 + $0x20] sm:$0xf]  ;;  %s1084_s6 = smov 23   ;;  %s1085_s7 = smov 16  }
  0x1e   : > { %v915_v7 = vld [vmem:[%s1161_s24 + $0x48] sm:$0xf]  ;;  %v925_v8 = vld [vmem:[%s1161_s24 + $0x18] sm:$0xf]  ;;  %v933_v9 = vld [vmem:[%s1161_s24 + $0x1c] sm:$0xf] }
  0x1f   : > { %v943_v10 = vld [vmem:[%s1161_s24 + $0x28] sm:$0xf]  ;;  %s1086_s8 = smov 31   ;;  %v908_v11 = vld [vmem:[%s1161_s24 + $0x54] sm:$0xf]  ;;  %vm197_vm1 = vcmask 60416  }
  0x20   : > { %605 = vrot.lane.b32.xlu0 %v940_v3, %s1082_s4  ;;  %511 = vrot.lane.b32.xlu1 %v924_v4, %s1083_s5  ;;  %v916_v12 = vld [vmem:[%s1161_s24 + $0x50] sm:$0xf]  ;;  %v926_v13 = vld [vmem:[%s1161_s24 + $0x20] sm:$0xf]  ;;  %s1087_s9 = smov 24   ;;  %s1088_s10 = smov 39  }
  0x21   : > { %v934_v14 = vld [vmem:[%s1161_s24 + $0x24] sm:$0xf]  ;;  %v923_v15 = vld [vmem:[%s1161_s24 + $0x8] sm:$0xf]  ;;  %v931_v16 = vld [vmem:[%s1161_s24 + $0xc] sm:$0xf] }
  0x22   : > { %508 = vst.msk [vmem:[#allocation2 + $0x18] sm:$0xf] %vm197_vm1, %v923_v15  ;;  %553 = vst.msk [vmem:[#allocation2 + $0x1c] sm:$0xf] %vm197_vm1, %v931_v16  ;;  %v944_v17 = vld [vmem:[%s1161_s24 + $0x30] sm:$0xf] }
  0x23   : > { %v307_v18 = vld [vmem:[%s1161_s24] sm:$0xf]  ;;  %v907_v19 = vld [vmem:[%s1161_s24 + $0x4c] sm:$0xf]  ;;  %v899_v20 = vld [vmem:[%s1161_s24 + $0x48] sm:$0xf] }
  0x24   : > { %556 = vrot.lane.b32.xlu0 %v932_v5, %s1083_s5  ;;  %617 = vrot.lane.b32.xlu1 %v942_v6, %s1084_s6  ;;  %409 = vst.msk [vmem:[#allocation2 + $0x10] sm:$0xf] %vm197_vm1, %v907_v19  ;;  %357 = vst.msk [vmem:[#allocation2 + $0xc] sm:$0xf] %vm197_vm1, %v899_v20  ;;  %v909_v21 = vld [vmem:[%s1161_s24 + $0x5c] sm:$0xf] }
  0x25   : > { %v917_v22 = vld [vmem:[%s1161_s24 + $0x58] sm:$0xf]  ;;  %v927_v23 = vld [vmem:[%s1161_s24 + $0x28] sm:$0xf]  ;;  %v935_v24 = vld [vmem:[%s1161_s24 + $0x2c] sm:$0xf] }
  0x26   : > { %s1089_s11 = smov 32   ;;  %v945_v25 = vld [vmem:[%s1161_s24 + $0x38] sm:$0xf]  ;;  %v892_v26 = vld [vmem:[%s1161_s24 + $0x8] sm:$0xf]  ;;  %s1090_s19 = smov 47  }
  0x27   : > { %v900_v27 = vld [vmem:[%s1161_s24 + $0x50] sm:$0xf]  ;;  %v910_v28 = vld [vmem:[%s1161_s24 + $0x64] sm:$0xf]  ;;  %v918_v29 = vld [vmem:[%s1161_s24 + $0x60] sm:$0xf] }
  0x28   : > { %461 = vrot.lane.b32.xlu0 %v915_v7, %s1081_s30  ;;  %517 = vrot.lane.b32.xlu1 %v925_v8, %s1085_s7  ;;  %v928_v30 = vld [vmem:[%s1161_s24 + $0x30] sm:$0xf]  ;;  %v1091_v31 = vmov 0.0   ;;  %s1092_s20 = smov 40   ;;  %v936_v32 = vld [vmem:[%s1161_s24 + $0x34] sm:$0xf] }
  0x29   : > { %960 = vmatprep.subr.mxu0 %v1091_v31  ;;  %v946_v33 = vld [vmem:[%s1161_s24 + $0x40] sm:$0xf]  ;;  %v884_v34 = vld [vmem:[%s1161_s24 + $0x4] sm:$0xf]  ;;  %s1093_s21 = smov 55   ;;  %s1094_s22 = smov 48  }
  0x2a   : > { %257 = vst.msk [vmem:[#allocation2 + $0x4] sm:$0xf] %vm197_vm1, %v884_v34  ;;  %v893_v35 = vld [vmem:[%s1161_s24 + $0x10] sm:$0xf]  ;;  %v901_v36 = vld [vmem:[%s1161_s24 + $0x58] sm:$0xf] }
  0x2b   : > { %v196_v37 = vld [vmem:[%s1161_s24] sm:$0xf]  ;;  %v911_v38 = vld [vmem:[%s1161_s24 + $0x6c] sm:$0xf]  ;;  %v919_v39 = vld [vmem:[%s1161_s24 + $0x68] sm:$0xf] }
  0x2c   : > { %562 = vrot.lane.b32.xlu0 %v933_v9, %s1085_s7  ;;  %623 = vrot.lane.b32.xlu1 %v943_v10, %s1086_s8  ;;  %198 = vst.msk [vmem:[#allocation2] sm:$0xf] %vm197_vm1, %v196_v37  ;;  %v929_v40 = vld [vmem:[%s1161_s24 + $0x38] sm:$0xf]  ;;  %v937_v41 = vld [vmem:[%s1161_s24 + $0x3c] sm:$0xf] }
  0x2d   : > { %v885_v42 = vld [vmem:[%s1161_s24 + $0xc] sm:$0xf]  ;;  %v877_v43 = vld [vmem:[%s1161_s24 + $0x8] sm:$0xf]  ;;  %v902_v44 = vld [vmem:[%s1161_s24 + $0x60] sm:$0xf] }
  0x2e   : > { %v894_v45 = vld [vmem:[%s1161_s24 + $0x18] sm:$0xf]  ;;  %v920_v46 = vld [vmem:[%s1161_s24 + $0x70] sm:$0xf]  ;;  %v912_v47 = vld [vmem:[%s1161_s24 + $0x74] sm:$0xf] }
  0x2f   : > { %v938_v48 = vld [vmem:[%s1161_s24 + $0x44] sm:$0xf]  ;;  %v930_v49 = vld [vmem:[%s1161_s24 + $0x40] sm:$0xf]  ;;  %s1095_s23 = smov 56   ;;  %vm205_vm2 = vcmask 126016  }
  0x30   : > { %413 = vrot.lane.b32.xlu0 %v908_v11, %s1083_s5  ;;  %467 = vrot.lane.b32.xlu1 %v916_v12, %s1082_s4  ;;  %v886_v50 = vld [vmem:[%s1161_s24 + $0x14] sm:$0xf]  ;;  %v878_v51 = vld [vmem:[%s1161_s24 + $0x10] sm:$0xf]  ;;  %vm213_vm3 = vcmask 191616   ;;  %vm221_vm4 = vcmask 257216  }
  0x31   : > { %v903_v52 = vld [vmem:[%s1161_s24 + $0x68] sm:$0xf]  ;;  %v895_v53 = vld [vmem:[%s1161_s24 + $0x20] sm:$0xf]  ;;  %v921_v54 = vld [vmem:[%s1161_s24 + $0x78] sm:$0xf] }
  0x32   : > { %v913_v55 = vld [vmem:[%s1161_s24 + $0x7c] sm:$0xf]  ;;  %v879_v57 = vld [vmem:[%s1161_s24 + $0x18] sm:$0xf]  ;;  %v904_v58 = vld [vmem:[%s1161_s24 + $0x70] sm:$0xf] }
  0x33   : > { %v887_v56 = vld [vmem:[%s1161_s24 + $0x1c] sm:$0xf]  ;;  %v896_v59 = vld [vmem:[%s1161_s24 + $0x28] sm:$0xf]  ;;  %v922_v60 = vld [vmem:[%s1161_s24 + $0x80] sm:$0xf] }
  0x34   : > { %523 = vrot.lane.b32.xlu0 %v926_v13, %s1087_s9  ;;  %568 = vrot.lane.b32.xlu1 %v934_v14, %s1087_s9  ;;  %v914_v61 = vld [vmem:[%s1161_s24 + $0x84] sm:$0xf]  ;;  %v880_v63 = vld [vmem:[%s1161_s24 + $0x20] sm:$0xf]  ;;  %vm1096_vm5 = vmmov 0   ;;  %vm229_vm6 = vcmask 322816  }
  0x35   : > { %v888_v62 = vld [vmem:[%s1161_s24 + $0x24] sm:$0xf]  ;;  %v905_v0 = vld [vmem:[%s1161_s24 + $0x78] sm:$0xf]  ;;  %v897_v1 = vld [vmem:[%s1161_s24 + $0x30] sm:$0xf]  ;;  %970 = vmatprep.mubr.msk.f32.mxu0 %vm1096_vm5, %v1091_v31 }
  0x36   : > { %v889_v2 = vld [vmem:[%s1161_s24 + $0x2c] sm:$0xf]  ;;  %v881_v3 = vld [vmem:[%s1161_s24 + $0x28] sm:$0xf]  ;;  %v906_v6 = vld [vmem:[%s1161_s24 + $0x80] sm:$0xf] }
  0x37   : > { %v898_v7 = vld [vmem:[%s1161_s24 + $0x38] sm:$0xf]  ;;  %v890_v10 = vld [vmem:[%s1161_s24 + $0x34] sm:$0xf]  ;;  %v882_v11 = vld [vmem:[%s1161_s24 + $0x30] sm:$0xf] }
  0x38   : > { %629 = vrot.lane.b32.xlu0 %v944_v17, %s1088_s10  ;;  %309 = vrot.lane.b32.xlu1 %v307_v18, %s1081_s30  ;;  %v891_v14 = vld [vmem:[%s1161_s24 + $0x3c] sm:$0xf]  ;;  %v883_v15 = vld [vmem:[%s1161_s24 + $0x38] sm:$0xf]  ;;  %vm237_vm7 = vcmask 388416   ;;  %vm245_vm8 = vcmask 454016  }
  0x39   : > { %vm253_vm9 = vcmask 519616   ;;  %vm655_vm10 = vcmask 1043456   ;;  %vm651_vm11 = vcmask 293888   ;;  %s949_s26 = sshll.u32 %s1061_s12, 3  ;;  %vm731_vm12 = vcmask 523264  }
  0x3a   : > { %s730_s27 = scalar_lea.vmem [#allocation3], %s949_s26  ;;  %vm738_vm13 = vcmask 7168   ;;  %vm746_vm14 = vcmask 15368  }
  0x3c   : > { %420 = vrot.lane.b32.xlu0 %v909_v21, %s1085_s7  ;;  %473 = vrot.lane.b32.xlu1 %v917_v22, %s1080_s29 }
  0x40   : > { %529 = vrot.lane.b32.xlu0 %v927_v23, %s1089_s11  ;;  %574 = vrot.lane.b32.xlu1 %v935_v24, %s1089_s11 }
  0x44   : > { %635 = vrot.lane.b32.xlu0 %v945_v25, %s1090_s19  ;;  %315 = vrot.lane.b32.xlu1 %v892_v26, %s1082_s4 }
  0x48   : > { %361 = vrot.lane.b32.xlu0 %v900_v27, %s1083_s5  ;;  %427 = vrot.lane.b32.xlu1 %v910_v28, %s1087_s9 }
  0x4c   : > { %479 = vrot.lane.b32.xlu0 %v918_v29, %s1084_s6  ;;  %535 = vrot.lane.b32.xlu1 %v928_v30, %s1092_s20 }
  0x50   : > { %580 = vrot.lane.b32.xlu0 %v936_v32, %s1092_s20  ;;  %641 = vrot.lane.b32.xlu1 %v946_v33, %s1093_s21 }
  0x54   : > { %321 = vrot.lane.b32.xlu0 %v893_v35, %s1080_s29  ;;  %368 = vrot.lane.b32.xlu1 %v901_v36, %s1085_s7 }
  0x58   : > { %434 = vrot.lane.b32.xlu0 %v911_v38, %s1089_s11  ;;  %485 = vrot.lane.b32.xlu1 %v919_v39, %s1086_s8 }
  0x5c   : > { %541 = vrot.lane.b32.xlu0 %v929_v40, %s1094_s22  ;;  %586 = vrot.lane.b32.xlu1 %v937_v41, %s1094_s22 }
  0x60   : > { %261 = vrot.lane.b32.xlu1 %v885_v42, %s1083_s5  ;;  %202 = vrot.lane.b32.xlu0 %v877_v43, %s1083_s5 }
  0x64   : > { %375 = vrot.lane.b32.xlu1 %v902_v44, %s1087_s9  ;;  %327 = vrot.lane.b32.xlu0 %v894_v45, %s1084_s6 }
  0x68   : > { %491 = vrot.lane.b32.xlu1 %v920_v46, %s1088_s10  ;;  %441 = vrot.lane.b32.xlu0 %v912_v47, %s1092_s20 }
  0x6c   : > { %593 = vrot.lane.b32.xlu1 %v938_v48, %s1095_s23  ;;  %548 = vrot.lane.b32.xlu0 %v930_v49, %s1095_s23 }
  0x70   : > { %268 = vrot.lane.b32.xlu1 %v886_v50, %s1085_s7  ;;  %210 = vrot.lane.b32.xlu0 %v878_v51, %s1085_s7 }
  0x74   : > { %382 = vrot.lane.b32.xlu1 %v903_v52, %s1089_s11  ;;  %333 = vrot.lane.b32.xlu0 %v895_v53, %s1086_s8 }
  0x78   : > { %497 = vrot.lane.b32.xlu1 %v921_v54, %s1090_s19  ;;  %448 = vrot.lane.b32.xlu0 %v913_v55, %s1094_s22 }
  0x7c   : > { %275 = vrot.lane.b32.xlu1 %v887_v56, %s1087_s9  ;;  %218 = vrot.lane.b32.xlu0 %v879_v57, %s1087_s9 }
  0x80   : > { %389 = vrot.lane.b32.xlu1 %v904_v58, %s1092_s20  ;;  %339 = vrot.lane.b32.xlu0 %v896_v59, %s1088_s10 }
  0x84   : > { %503 = vrot.lane.b32.xlu1 %v922_v60, %s1093_s21  ;;  %455 = vrot.lane.b32.xlu0 %v914_v61, %s1095_s23 }
  0x88   : > { %282 = vrot.lane.b32.xlu1 %v888_v62, %s1089_s11  ;;  %226 = vrot.lane.b32.xlu0 %v880_v63, %s1089_s11 }
  0x8c   : > { %396 = vrot.lane.b32.xlu1 %v905_v0, %s1094_s22  ;;  %345 = vrot.lane.b32.xlu0 %v897_v1, %s1090_s19 }
  0x8e   : > { %v612_v4 = vpop.permute.xlu1 %611  ;;  %v600_v5 = vpop.permute.xlu0 %599 }
  0x8f   : > { %602 = vst.msk [vmem:[#allocation2 + $0x20] sm:$0xf] %vm197_vm1, %v600_v5 }
  0x90   : > { %289 = vrot.lane.b32.xlu1 %v889_v2, %s1092_s20  ;;  %234 = vrot.lane.b32.xlu0 %v881_v3, %s1092_s20 }
  0x92   : > { %v606_v8 = vpop.permute.xlu0 %605  ;;  %v512_v9 = vpop.permute.xlu1 %511 }
  0x93   : > { %608 = vst.msk [vmem:[#allocation2 + $0x20] sm:$0xf] %vm205_vm2, %v606_v8  ;;  %514 = vst.msk [vmem:[#allocation2 + $0x18] sm:$0xf] %vm205_vm2, %v512_v9 }
  0x94   : > { %403 = vrot.lane.b32.xlu1 %v906_v6, %s1095_s23  ;;  %351 = vrot.lane.b32.xlu0 %v898_v7, %s1093_s21  ;;  %614 = vst.msk [vmem:[#allocation2 + $0x20] sm:$0xf] %vm213_vm3, %v612_v4 }
  0x96   : > { %v557_v12 = vpop.permute.xlu0 %556  ;;  %v618_v13 = vpop.permute.xlu1 %617 }
  0x97   : > { %559 = vst.msk [vmem:[#allocation2 + $0x1c] sm:$0xf] %vm205_vm2, %v557_v12 }
  0x98   : > { %620 = vst.msk [vmem:[#allocation2 + $0x20] sm:$0xf] %vm221_vm4, %v618_v13  ;;  %296 = vrot.lane.b32.xlu1 %v890_v10, %s1094_s22  ;;  %242 = vrot.lane.b32.xlu0 %v882_v11, %s1094_s22 }
  0x9a   : > { %v462_v16 = vpop.permute.xlu0 %461  ;;  %v518_v17 = vpop.permute.xlu1 %517 }
  0x9b   : > { %464 = vst.msk [vmem:[#allocation2 + $0x14] sm:$0xf] %vm197_vm1, %v462_v16 }
  0x9c   : > { %520 = vst.msk [vmem:[#allocation2 + $0x18] sm:$0xf] %vm213_vm3, %v518_v17  ;;  %303 = vrot.lane.b32.xlu1 %v891_v14, %s1095_s23  ;;  %250 = vrot.lane.b32.xlu0 %v883_v15, %s1095_s23  ;;  %v645_v17 = vld [vmem:[%s1412_s1] sm:$0xff] }
  0x9e   : > { %v563_v18 = vpop.permute.xlu0 %562  ;;  %v624_v19 = vpop.permute.xlu1 %623 }
  0x9f   : > { %565 = vst.msk [vmem:[#allocation2 + $0x1c] sm:$0xf] %vm213_vm3, %v563_v18 }
  0xa0   : > { %626 = vst.msk [vmem:[#allocation2 + $0x20] sm:$0xf] %vm229_vm6, %v624_v19 }
  0xa2   : > { %v414_v20 = vpop.permute.xlu0 %413  ;;  %v468_v21 = vpop.permute.xlu1 %467 }
  0xa3   : > { %416 = vst.msk [vmem:[#allocation2 + $0x10] sm:$0xf] %vm205_vm2, %v414_v20  ;;  %470 = vst.msk [vmem:[#allocation2 + $0x14] sm:$0xf] %vm205_vm2, %v468_v21 }
  0xa6   : > { %v524_v22 = vpop.permute.xlu0 %523  ;;  %v569_v23 = vpop.permute.xlu1 %568 }
  0xa7   : > { %526 = vst.msk [vmem:[#allocation2 + $0x18] sm:$0xf] %vm221_vm4, %v524_v22  ;;  %571 = vst.msk [vmem:[#allocation2 + $0x1c] sm:$0xf] %vm221_vm4, %v569_v23 }
  0xaa   : > { %v630_v24 = vpop.permute.xlu0 %629  ;;  %v310_v25 = vpop.permute.xlu1 %309 }
  0xab   : > { %632 = vst.msk [vmem:[#allocation2 + $0x20] sm:$0xf] %vm237_vm7, %v630_v24 }
  0xac   : > { %312 = vst.msk [vmem:[#allocation2 + $0x8] sm:$0xf] %vm197_vm1, %v310_v25 }
  0xae   : > { %v421_v26 = vpop.permute.xlu0 %420  ;;  %v474_v27 = vpop.permute.xlu1 %473 }
  0xaf   : > { %423 = vst.msk [vmem:[#allocation2 + $0x10] sm:$0xf] %vm213_vm3, %v421_v26  ;;  %476 = vst.msk [vmem:[#allocation2 + $0x14] sm:$0xf] %vm213_vm3, %v474_v27 }
  0xb2   : > { %v530_v28 = vpop.permute.xlu0 %529  ;;  %v575_v29 = vpop.permute.xlu1 %574 }
  0xb3   : > { %532 = vst.msk [vmem:[#allocation2 + $0x18] sm:$0xf] %vm229_vm6, %v530_v28  ;;  %577 = vst.msk [vmem:[#allocation2 + $0x1c] sm:$0xf] %vm229_vm6, %v575_v29 }
  0xb6   : > { %v636_v30 = vpop.permute.xlu0 %635  ;;  %v316_v32 = vpop.permute.xlu1 %315 }
  0xb7   : > { %638 = vst.msk [vmem:[#allocation2 + $0x20] sm:$0xf] %vm245_vm8, %v636_v30 }
  0xb8   : > { %318 = vst.msk [vmem:[#allocation2 + $0x8] sm:$0xf] %vm205_vm2, %v316_v32 }
  0xba   : > { %v362_v33 = vpop.permute.xlu0 %361  ;;  %v428_v34 = vpop.permute.xlu1 %427 }
  0xbb   : > { %364 = vst.msk [vmem:[#allocation2 + $0xc] sm:$0xf] %vm205_vm2, %v362_v33 }
  0xbc   : > { %430 = vst.msk [vmem:[#allocation2 + $0x10] sm:$0xf] %vm221_vm4, %v428_v34 }
  0xbe   : > { %v480_v35 = vpop.permute.xlu0 %479  ;;  %v536_v36 = vpop.permute.xlu1 %535 }
  0xbf   : > { %482 = vst.msk [vmem:[#allocation2 + $0x14] sm:$0xf] %vm221_vm4, %v480_v35 }
  0xc0   : > { %538 = vst.msk [vmem:[#allocation2 + $0x18] sm:$0xf] %vm237_vm7, %v536_v36 }
  0xc2   : > { %v581_v37 = vpop.permute.xlu0 %580  ;;  %v642_v38 = vpop.permute.xlu1 %641 }
  0xc3   : > { %583 = vst.msk [vmem:[#allocation2 + $0x1c] sm:$0xf] %vm237_vm7, %v581_v37 }
  0xc4   : > { %644 = vst.msk [vmem:[#allocation2 + $0x20] sm:$0xf] %vm253_vm9, %v642_v38 }
  0xc6   : > { %v322_v39 = vpop.permute.xlu0 %321  ;;  %v369_v40 = vpop.permute.xlu1 %368 }
  0xc7   : > { %324 = vst.msk [vmem:[#allocation2 + $0x8] sm:$0xf] %vm213_vm3, %v322_v39  ;;  %371 = vst.msk [vmem:[#allocation2 + $0xc] sm:$0xf] %vm213_vm3, %v369_v40 }
  0xca   : > { %v435_v41 = vpop.permute.xlu0 %434  ;;  %v486_v42 = vpop.permute.xlu1 %485 }
  0xcb   : > { %v650_v43 = vld [vmem:[#allocation2 + $0x20] sm:$0xf]  ;;  %437 = vst.msk [vmem:[#allocation2 + $0x10] sm:$0xf] %vm229_vm6, %v435_v41  ;;  %488 = vst.msk [vmem:[#allocation2 + $0x14] sm:$0xf] %vm229_vm6, %v486_v42 }
  0xcc   : > { %961 = vmatpush3.msk.msra.mxu0 %vm655_vm10, %v650_v43 }
  0xcd   : > { %962 = vmatprep.subr.mxu0 %v1091_v31 }
  0xce   : > { %v542_v44 = vpop.permute.xlu0 %541  ;;  %v587_v45 = vpop.permute.xlu1 %586 }
  0xcf   : > { %544 = vst.msk [vmem:[#allocation2 + $0x18] sm:$0xf] %vm245_vm8, %v542_v44  ;;  %589 = vst.msk [vmem:[#allocation2 + $0x1c] sm:$0xf] %vm245_vm8, %v587_v45 }
  0xd2   : > { %v262_v46 = vpop.permute.xlu1 %261  ;;  %v203_v47 = vpop.permute.xlu0 %202 }
  0xd3   : > { %264 = vst.msk [vmem:[#allocation2 + $0x4] sm:$0xf] %vm205_vm2, %v262_v46  ;;  %206 = vst.msk [vmem:[#allocation2] sm:$0xf] %vm205_vm2, %v203_v47 }
  0xd6   : > { %v376_v48 = vpop.permute.xlu1 %375  ;;  %v328_v49 = vpop.permute.xlu0 %327 }
  0xd7   : > { %378 = vst.msk [vmem:[#allocation2 + $0xc] sm:$0xf] %vm221_vm4, %v376_v48  ;;  %330 = vst.msk [vmem:[#allocation2 + $0x8] sm:$0xf] %vm221_vm4, %v328_v49 }
  0xda   : > { %v492_v50 = vpop.permute.xlu1 %491  ;;  %v442_v51 = vpop.permute.xlu0 %441 }
  0xdb   : > { %494 = vst.msk [vmem:[#allocation2 + $0x14] sm:$0xf] %vm237_vm7, %v492_v50  ;;  %444 = vst.msk [vmem:[#allocation2 + $0x10] sm:$0xf] %vm237_vm7, %v442_v51 }
  0xde   : > { %v594_v52 = vpop.permute.xlu1 %593  ;;  %v549_v53 = vpop.permute.xlu0 %548 }
  0xdf   : > { %596 = vst.msk [vmem:[#allocation2 + $0x1c] sm:$0xf] %vm253_vm9, %v594_v52  ;;  %551 = vst.msk [vmem:[#allocation2 + $0x18] sm:$0xf] %vm253_vm9, %v549_v53 }
  0xe2   : > { %v269_v54 = vpop.permute.xlu1 %268  ;;  %v211_v55 = vpop.permute.xlu0 %210 }
  0xe3   : > { %271 = vst.msk [vmem:[#allocation2 + $0x4] sm:$0xf] %vm213_vm3, %v269_v54  ;;  %214 = vst.msk [vmem:[#allocation2] sm:$0xf] %vm213_vm3, %v211_v55 }
  0xe6   : > { %v383_v56 = vpop.permute.xlu1 %382  ;;  %v334_v57 = vpop.permute.xlu0 %333  ;;  %v649_v58 = vld [vmem:[#allocation2 + $0x18] sm:$0xff] }
  0xe7   : > { %385 = vst.msk [vmem:[#allocation2 + $0xc] sm:$0xf] %vm229_vm6, %v383_v56  ;;  %336 = vst.msk [vmem:[#allocation2 + $0x8] sm:$0xf] %vm229_vm6, %v334_v57  ;;  %963 = vmatpush3.msra.mxu0 %v649_v58 }
  0xe8   : > { %964 = vmatprep.subr.mxu0 %v1091_v31 }
  0xea   : > { %v498_v59 = vpop.permute.xlu1 %497  ;;  %v449_v60 = vpop.permute.xlu0 %448 }
  0xeb   : > { %500 = vst.msk [vmem:[#allocation2 + $0x14] sm:$0xf] %vm245_vm8, %v498_v59  ;;  %451 = vst.msk [vmem:[#allocation2 + $0x10] sm:$0xf] %vm245_vm8, %v449_v60 }
  0xee   : > { %v276_v61 = vpop.permute.xlu1 %275  ;;  %v219_v62 = vpop.permute.xlu0 %218 }
  0xef   : > { %278 = vst.msk [vmem:[#allocation2 + $0x4] sm:$0xf] %vm221_vm4, %v276_v61  ;;  %222 = vst.msk [vmem:[#allocation2] sm:$0xf] %vm221_vm4, %v219_v62 }
  0xf2   : > { %v390_v63 = vpop.permute.xlu1 %389  ;;  %v340_v0 = vpop.permute.xlu0 %339 }
  0xf3   : > { %392 = vst.msk [vmem:[#allocation2 + $0xc] sm:$0xf] %vm237_vm7, %v390_v63  ;;  %342 = vst.msk [vmem:[#allocation2 + $0x8] sm:$0xf] %vm237_vm7, %v340_v0 }
  0xf6   : > { %v504_v1 = vpop.permute.xlu1 %503  ;;  %v456_v2 = vpop.permute.xlu0 %455 }
  0xf7   : > { %506 = vst.msk [vmem:[#allocation2 + $0x14] sm:$0xf] %vm253_vm9, %v504_v1  ;;  %458 = vst.msk [vmem:[#allocation2 + $0x10] sm:$0xf] %vm253_vm9, %v456_v2 }
  0xfa   : > { %v283_v3 = vpop.permute.xlu1 %282  ;;  %v227_v4 = vpop.permute.xlu0 %226 }
  0xfb   : > { %285 = vst.msk [vmem:[#allocation2 + $0x4] sm:$0xf] %vm229_vm6, %v283_v3  ;;  %230 = vst.msk [vmem:[#allocation2] sm:$0xf] %vm229_vm6, %v227_v4 }
  0xfe   : > { %v397_v5 = vpop.permute.xlu1 %396  ;;  %v346_v6 = vpop.permute.xlu0 %345  ;;  %v648_v7 = vld [vmem:[#allocation2 + $0x10] sm:$0xff] }
  0xff   : > { %399 = vst.msk [vmem:[#allocation2 + $0xc] sm:$0xf] %vm245_vm8, %v397_v5  ;;  %348 = vst.msk [vmem:[#allocation2 + $0x8] sm:$0xf] %vm245_vm8, %v346_v6  ;;  %965 = vmatpush3.msra.mxu0 %v648_v7 }
 0x100   : > { %966 = vmatprep.subr.mxu0 %v1091_v31 }
 0x102   : > { %v290_v8 = vpop.permute.xlu1 %289  ;;  %v235_v9 = vpop.permute.xlu0 %234 }
 0x103   : > { %292 = vst.msk [vmem:[#allocation2 + $0x4] sm:$0xf] %vm237_vm7, %v290_v8  ;;  %238 = vst.msk [vmem:[#allocation2] sm:$0xf] %vm237_vm7, %v235_v9 }
 0x106   : > { %v404_v10 = vpop.permute.xlu1 %403  ;;  %v352_v11 = vpop.permute.xlu0 %351 }
 0x107   : > { %406 = vst.msk [vmem:[#allocation2 + $0xc] sm:$0xf] %vm253_vm9, %v404_v10  ;;  %354 = vst.msk [vmem:[#allocation2 + $0x8] sm:$0xf] %vm253_vm9, %v352_v11 }
 0x10a   : > { %v297_v12 = vpop.permute.xlu1 %296  ;;  %v243_v13 = vpop.permute.xlu0 %242 }
 0x10b   : > { %299 = vst.msk [vmem:[#allocation2 + $0x4] sm:$0xf] %vm245_vm8, %v297_v12  ;;  %246 = vst.msk [vmem:[#allocation2] sm:$0xf] %vm245_vm8, %v243_v13 }
 0x10e   : > { %v304_v14 = vpop.permute.xlu1 %303  ;;  %v251_v15 = vpop.permute.xlu0 %250  ;;  %v647_v16 = vld [vmem:[#allocation2 + $0x8] sm:$0xff] }
 0x10f   : > { %306 = vst.msk [vmem:[#allocation2 + $0x4] sm:$0xf] %vm253_vm9, %v304_v14  ;;  %254 = vst.msk [vmem:[#allocation2] sm:$0xf] %vm253_vm9, %v251_v15  ;;  %967 = vmatpush3.msra.mxu0 %v647_v16 }
 0x110   : > { %968 = vmatprep.subr.mxu0 %v1091_v31  ;;  %v733_v31 = vld [vmem:[#allocation4] sm:$0xff] }
 0x116   : > { %v646_v18 = vld [vmem:[#allocation2] sm:$0xff] }
 0x117   : > { %969 = vmatpush3.msra.mxu0 %v646_v18 }
 0x118   : > { %971 = vmatmul.mubr.msk.f32.vlgmr.msra.gmra.mxu0 %vm651_vm11, %v645_v17 }
 0x1d8   : > { %v725_v19 = vpop.f32.mrf.mxu0 }
 0x1d9   : > { %v734_v20 = vsel %vm731_vm12, %v725_v19, 0.0  ;;  %732 = vst.msk [vmem:[%s730_s27] sm:$0xff] %vm731_vm12, %v725_v19  ;;  %v741_v21 = vmul.f32 %v725_v19, %v725_v19 }
 0x1da   : > { %735 = vadd.xlane.f32.xlu0 %v734_v20  ;;  %v972_v22 = vpop.f32.mrf.mxu0 }
 0x1db   : > { %v742_v23 = vsel %vm731_vm12, %v741_v21, 0.0 }
 0x1dc   : > { %743 = vadd.xlane.f32.xlu1 %v742_v23 }
 0x263   : > { %v736_v24 = vpop.xlane.xlu0 %735 }
 0x264   : > { %v737_v25 = vadd.f32 %v736_v24, %v733_v31 }
 0x265   : > { %v744_v26 = vpop.xlane.xlu1 %743 }
 0x266   : > { %739 = vst.msk [vmem:[#allocation4] sm:$0xff] %vm738_vm13, %v737_v25 }
 0x26d   : > { %v740_v27 = vld [vmem:[#allocation4] sm:$0xff] }
 0x26e   : > { %v745_v28 = vadd.f32 %v744_v26, %v740_v27 }
 0x270   : > { %747 = vst.msk [vmem:[#allocation4] sm:$0xff] %vm746_vm14, %v745_v28 }
 0x271 PF: > { %p950_p9 = scmp.ne.s32.totalorder %s1065_s13, 1 }
 0x272   : > { %s1097_s29 = smov (!%p950_p9), 1   ;;  %s1099_s13 = smov (!%p950_p9), 127  }
 0x273   : > { %751 = sbr.rel (%p950_p9) target bundleno = 1137 (0x471), region = 44  ;;  %s951_s5 = sshll.u32 (!%p950_p9), %s1061_s12, 3 }
 0x274   : > { %s780_s6 = scalar_lea.vmem (!%p950_p9), [#allocation3], %s951_s5 }
 0x278   : > { %v752_v29 = vld [vmem:[#allocation4] sm:$0xff]  ;;  %v763_v33 = vld [vmem:[%s1413_s2] sm:$0xff]  ;;  %v1098_v34 = vmov 1   ;;  %vm794_vm15 = vcmask 523264  }
 0x279   : > { %v753_v30 = vmul.f32 0.0078125, %v752_v29  ;;  %1035 = vset.pattern.permute.xlu0 %v1098_v34  ;;  %1036 = vset.pattern.permute.xlu1 %v1098_v34  ;;  %v781_v46 = vld [vmem:[%s780_s6] sm:$0xff] }
 0x27b   : > { %v754_v32 = vmul.f32 %v753_v30, %v753_v30 }
 0x27d   : > { %756 = vrot.lane.b32.xlu0 %v754_v32, %s1097_s29 }
 0x281   : > { %765 = vrot.lane.b32.xlu0 %v763_v33, %s1097_s29 }
 0x2ef   : > { %v757_v35 = vpop.permute.xlu0 %756 }
 0x2f0   : > { %v759_v36 = vsub.f32 %v753_v30, %v757_v35 }
 0x2f2   : > { %v760_v37 = vmax.f32 %v759_v36, 0.0 }
 0x2f3   : > { %v766_v39 = vpop.permute.xlu0 %765 }
 0x2f4   : > { %v761_v38 = vadd.f32 1e-05, %v760_v37 }
 0x2f6   : > { %1037 = vrsqrt.f32 %v761_v38 }
 0x303   : > { %v1038_v40 = vpop.eup %1037 }
 0x304   : > { %v768_v41 = vmul.f32 %v1038_v40, %v766_v39 }
 0x306   : > { %783 = vperm.xlu0 %1035, %v768_v41   ;;  %770 = vrot.lane.b32.xlu1 %v768_v41, %s1099_s13 }
 0x378   : > { %v771_v42 = vpop.permute.xlu1 %770 }
 0x379   : > { %v773_v43 = vmul.f32 %v771_v42, %v753_v30 }
 0x37b   : > { %775 = vrot.lane.b32.xlu1 %v773_v43, %s1097_s29 }
 0x381   : > { %v784_v47 = vpop.permute.xlu0 %783 }
 0x382   : > { %v786_v48 = vmul.f32 %v784_v47, %v781_v46 }
 0x3ed   : > { %v776_v44 = vpop.permute.xlu1 %775 }
 0x3ee   : > { %v778_v45 = vsub.f32 %v763_v33, %v776_v44 }
 0x3f0   : > { %789 = vperm.xlu1 %1036, %v778_v45  }
 0x46b   : > { %v790_v49 = vpop.permute.xlu1 %789 }
 0x46c   : > { %v792_v50 = vadd.f32 %v790_v49, %v786_v48 }
 0x46e   : > { %v793_v51 = vmax.f32 %v792_v50, 0.0 }
 0x470   : > { %795 = vst.msk [vmem:[%s1166_s28] sm:$0xff] %vm794_vm15, %v793_v51 }
 0x471 PF: > { %s13_s16 = sadd.s32 1, %s1077_s16   ;;  %s1415_s12 = smov %s1069_s14 }
 0x472   : > { %p10_p10 = scmp.ge.s32.totalorder %s13_s16, 6   ;;  %s1416_s13 = smov %s1073_s15 }
 0x473   : > { %s1417_s14 = smov %s1420_s17  ;;  %s1418_s15 = smov %s1424_s18 }
 0x474   :  { %12 = sbr.rel (!%p10_p10) target bundleno = 3 (0x3), region = 109 }

</bundles_post_ra>
